<compile_context>
chip_gen: v5e
topology: v5e:2x2
jax: 0.10.0
libtpu: 0.0.40
codegen_flags: <defaults>
</compile_context>

<pallas_src>
import functools

import numpy as np

import jax
import jax.numpy as jnp
from jax.experimental import pallas as pl
from jax.experimental.pallas import tpu as pltpu


def _yolo_kernel(off_ref, p_ref, o_ref, *, stride, anchors, transpose_out):
    """Decode one (BN, A, D, BG) block of raw predictions.

    off_ref: VMEM (2, BG) f32; row 0 = gx, row 1 = gy for this spatial chunk.
    p_ref:   VMEM (BN, A, D, BG) raw predictions (any float dtype).
    o_ref:   VMEM (BN, A, BG, D) if transpose_out else (BN, A, D, BG), f32.
    """
    p = p_ref[...].astype(jnp.float32)                      # (BN, A, D, BG)
    _, A, D, _ = p.shape

    # Per-channel masks kept tiny: (1, 1, D, 1).
    ch = jax.lax.broadcasted_iota(jnp.int32, (1, 1, D, 1), 2)
    is_wh = jnp.logical_or(ch == 2, ch == 3)                # exp() channels

    # Single EUP exp pass: exp(p) where we need exp, exp(-p) where we need a
    # sigmoid.  sigmoid(p) = 1 / (1 + exp(-p)) via the (nearly free) approx
    # reciprocal.
    e = jnp.exp(jnp.where(is_wh, p, -p))
    sig = pl.reciprocal(1.0 + e, approx=True)

    # Cell offsets (precomputed at trace time; no int div/mod in the kernel).
    gx = off_ref[0:1, :]                                    # (1, BG)
    gy = off_ref[1:2, :]                                    # (1, BG)
    off = jnp.where(ch == 0, gx, jnp.where(ch == 1, gy, jnp.float32(0.0)))
    scale = jnp.where(ch < 2, jnp.float32(stride), jnp.float32(1.0))
    # x/y: (sigmoid + cell) * stride;  conf/cls: sigmoid (scale == 1).
    sig_part = (sig + off) * scale

    # w/h: exp(t) * (anchor / stride) * stride == exp(t) * anchor, with the
    # anchors baked in as compile-time scalars (no operand, no SMEM loads).
    a_idx = jax.lax.broadcasted_iota(jnp.int32, (1, A, 1, 1), 1)
    aw = jnp.full((1, A, 1, 1), anchors[-1][0], jnp.float32)
    ah = jnp.full((1, A, 1, 1), anchors[-1][1], jnp.float32)
    for a in range(A - 1):
        aw = jnp.where(a_idx == a, jnp.float32(anchors[a][0]), aw)
        ah = jnp.where(a_idx == a, jnp.float32(anchors[a][1]), ah)
    anc = jnp.where(ch == 2, aw, jnp.where(ch == 3, ah, jnp.float32(1.0)))
    wh_part = e * anc

    res = jnp.where(is_wh, wh_part, sig_part)               # (BN, A, D, BG)

    if transpose_out:
        # Emit the module's channel-minor layout directly (XLU minor-dim
        # transpose), so no separate HBM transpose pass is needed.
        o_ref[...] = jnp.swapaxes(res, 2, 3)                # (BN, A, BG, D)
    else:
        o_ref[...] = res                                    # lane-dense layout


def _choose_tiling(N, A, D, GG, in_itemsize):
    """Pick (batch-chunk, spatial-chunk) block sizes.

    Targets a few MiB of VMEM per block (in + channel-minor out, both
    double-buffered stays far below the 32 MiB default scoped limit and
    v7x's 64 MiB physical VMEM) and guarantees >= 2 parallel grid steps so
    both v7x TensorCores get work even for tiny batches.
    """
    bg = GG                                   # full fused-spatial extent first
    padded_d = -(-D // 128) * 128             # lane padding of the D-minor out
    per_img = A * bg * (D * in_itemsize + padded_d * 4)
    budget = 4 << 20                          # ~4 MiB of live blocks
    bn = 1
    for cand in range(N, 0, -1):
        if N % cand == 0 and cand * per_img <= budget:
            bn = cand
            break
    # v7x megacore: make sure there are at least 2 parallel grid steps.
    while (N // bn) * (GG // bg) < 2:
        if bg % 256 == 0:
            bg //= 2                          # stays a 128-multiple divisor of GG
        elif bn > 1:
            bn = max(c for c in range(1, bn) if N % c == 0)
        else:
            break
    return bn, bg


def yolo_layer(prediction, anchors, num_classes, img_dim):
    """prediction: (N, A*(num_classes+5), G, G), NCHW like the PyTorch module."""
    N, C, G, G2 = prediction.shape
    A = len(anchors)
    D = num_classes + 5
    assert C == A * D and G == G2
    GG = G * G
    stride = float(img_dim) / float(G)

    # Lane-dense view of the raw head output: (N, A, D, G*G)  [free reshape].
    # The input dtype is kept as-is (bf16 upcasts inside the kernel).
    pred = prediction.reshape(N, A, D, GG)

    # Precomputed cell offsets: avoids % / // by a (generally non-pow2) G.
    cells = np.arange(GG)
    off = jnp.asarray(
        np.stack([(cells % G).astype(np.float32),
                  (cells // G).astype(np.float32)], axis=0))       # (2, GG)

    bn, bg = _choose_tiling(N, A, D, GG, pred.dtype.itemsize)
    grid = (N // bn, GG // bg)
    params = pltpu.CompilerParams(dimension_semantics=("parallel", "parallel"))
    in_specs = [
        pl.BlockSpec((2, bg), lambda i, j: (0, j)),                # cell offsets
        pl.BlockSpec((bn, A, D, bg), lambda i, j: (i, 0, 0, j)),   # predictions
    ]
    anchors_t = tuple((float(w), float(h)) for w, h in anchors)

    def call(transpose_out):
        kern = functools.partial(_yolo_kernel, stride=stride,
                                 anchors=anchors_t,
                                 transpose_out=transpose_out)
        if transpose_out:
            out_shape = jax.ShapeDtypeStruct((N, A, GG, D), jnp.float32)
            out_spec = pl.BlockSpec((bn, A, bg, D), lambda i, j: (i, 0, j, 0))
        else:
            out_shape = jax.ShapeDtypeStruct((N, A, D, GG), jnp.float32)
            out_spec = pl.BlockSpec((bn, A, D, bg), lambda i, j: (i, 0, 0, j))
        return pl.pallas_call(
            kern,
            out_shape=out_shape,
            grid=grid,
            in_specs=in_specs,
            out_specs=out_spec,
            compiler_params=params,
        )(off, pred)

    try:
        # Preferred path: kernel emits the channel-minor layout, so the exact
        # PyTorch (N, A*G*G, D) output is a pure metadata reshape (no extra
        # HBM round trip for a transpose pass).
        out = call(transpose_out=True)
        return out.reshape(N, A * GG, D)
    except Exception:
        # TODO(synk): fallback only for Mosaic builds that cannot lower the
        # in-kernel minor-dim transpose; this path pays one extra XLA
        # transpose pass over the output tensor.
        out = call(transpose_out=False)
        return jnp.transpose(out, (0, 1, 3, 2)).reshape(N, A * GG, D)


def yolo_layer_ref(prediction, anchors, num_classes, img_dim):
    """Pure-JAX reference mirroring the PyTorch forward exactly."""
    N, _, G, _ = prediction.shape
    A = len(anchors)
    D = num_classes + 5
    stride = float(img_dim) / float(G)

    p = prediction.astype(jnp.float32).reshape(N, A, D, G, G)
    p = jnp.transpose(p, (0, 1, 3, 4, 2))                  # (N, A, G, G, D)
    sx = jax.nn.sigmoid(p[..., 0])
    sy = jax.nn.sigmoid(p[..., 1])
    w = p[..., 2]
    h = p[..., 3]
    conf = jax.nn.sigmoid(p[..., 4])
    cls = jax.nn.sigmoid(p[..., 5:])

    gy, gx = jnp.meshgrid(jnp.arange(G), jnp.arange(G), indexing="ij")
    gx = gx.astype(jnp.float32)
    gy = gy.astype(jnp.float32)

    anc = jnp.asarray(anchors, jnp.float32) / stride
    aw = anc[:, 0].reshape(1, A, 1, 1)
    ah = anc[:, 1].reshape(1, A, 1, 1)

    bx = sx + gx
    by = sy + gy
    bw = jnp.exp(w) * aw
    bh = jnp.exp(h) * ah
    boxes = jnp.stack([bx, by, bw, bh], axis=-1).reshape(N, -1, 4) * stride
    return jnp.concatenate(
        [boxes, conf.reshape(N, -1, 1), cls.reshape(N, -1, num_classes)], axis=-1)


if __name__ == "__main__":
    # Deterministic synthetic setup (module __init__ params chosen in-script).
    anchors = [(10.0, 13.0), (16.0, 30.0), (33.0, 23.0)]
    num_classes = 3
    img_dim = 128
    N, G = 2, 16
    A = len(anchors)
    D = num_classes + 5

    key = jax.random.PRNGKey(0)
    x = jax.random.normal(key, (N, A * D, G, G), dtype=jnp.float32)

    out = jax.block_until_ready(yolo_layer(x, anchors, num_classes, img_dim))
    ref = yolo_layer_ref(x, anchors, num_classes, img_dim)

    assert out.shape == (N, A * G * G, D), out.shape
    assert out.dtype == jnp.float32
    # Tolerance loosened (per review) to accommodate the EUP approx reciprocal
    # used for the sigmoid path; the exact-divide path matches to ~1e-5.
    assert bool(jnp.allclose(out, ref, atol=3e-2, rtol=3e-3)), "mismatch vs reference"

    print("KERNEL_OK")
</pallas_src>

<mosaic_0001>
module attributes {stable_mosaic.version = 11 : i64} {
  func.func @_yolo_kernel(%arg0: i32, %arg1: i32, %arg2: memref<2x128xf32, #tpu.memory_space<vmem>>, %arg3: memref<2x3x8x128xf32, #tpu.memory_space<vmem>>, %arg4: memref<2x3x128x8xf32, #tpu.memory_space<vmem>>) attributes {dimension_semantics = [#tpu.dimension_semantics<parallel>, #tpu.dimension_semantics<parallel>], iteration_bounds = array<i64: 1, 2>, scalar_prefetch = 0 : i64, scratch_operands = 0 : i64, tpu.core_type = #tpu.core_type<tc>, window_params = [{transform_indices = @transform_0, window_bounds = array<i64: 2, 128>}, {transform_indices = @transform_1, window_bounds = array<i64: 2, 3, 8, 128>}, {transform_indices = @transform_2, window_bounds = array<i64: 2, 3, 128, 8>}]} {
    %c0 = arith.constant 0 : index
    %c0_0 = arith.constant 0 : index
    %c0_1 = arith.constant 0 : index
    %c0_2 = arith.constant 0 : index
    %0 = vector.load %arg3[%c0, %c0_0, %c0_1, %c0_2] : memref<2x3x8x128xf32, #tpu.memory_space<vmem>>, vector<2x3x8x128xf32>
    %1 = tpu.iota {dimensions = array<i32: 2>} : vector<1x1x8x1xi32>
    %c2_i32 = arith.constant 2 : i32
    %2 = vector.broadcast %c2_i32 : i32 to vector<1x1x8x1xi32>
    %3 = arith.cmpi eq, %1, %2 : vector<1x1x8x1xi32>
    %c3_i32 = arith.constant 3 : i32
    %4 = vector.broadcast %c3_i32 : i32 to vector<1x1x8x1xi32>
    %5 = arith.cmpi eq, %1, %4 : vector<1x1x8x1xi32>
    %6 = arith.ori %3, %5 : vector<1x1x8x1xi1>
    %cst = arith.constant 0.000000e+00 : f32
    %7 = vector.broadcast %cst : f32 to vector<2x3x8x128xf32>
    %8 = arith.subf %7, %0 : vector<2x3x8x128xf32>
    %9 = vector.shape_cast %6 : vector<1x1x8x1xi1> to vector<1x1x8x1xi1>
    %10 = vector.broadcast %9 : vector<1x1x8x1xi1> to vector<2x3x8x128xi1>
    %11 = arith.select %10, %0, %8 : vector<2x3x8x128xi1>, vector<2x3x8x128xf32>
    %12 = math.exp %11 : vector<2x3x8x128xf32>
    %cst_3 = arith.constant 1.000000e+00 : f32
    %13 = vector.broadcast %cst_3 : f32 to vector<2x3x8x128xf32>
    %14 = arith.addf %13, %12 : vector<2x3x8x128xf32>
    %15 = tpu.reciprocal %14 {approx = true} : vector<2x3x8x128xf32> -> vector<2x3x8x128xf32>
    %c0_4 = arith.constant 0 : index
    %c0_5 = arith.constant 0 : index
    %16 = vector.load %arg2[%c0_4, %c0_5] : memref<2x128xf32, #tpu.memory_space<vmem>>, vector<1x128xf32>
    %c1 = arith.constant 1 : index
    %c0_6 = arith.constant 0 : index
    %17 = vector.load %arg2[%c1, %c0_6] : memref<2x128xf32, #tpu.memory_space<vmem>>, vector<1x128xf32>
    %c0_i32 = arith.constant 0 : i32
    %18 = vector.broadcast %c0_i32 : i32 to vector<1x1x8x1xi32>
    %19 = arith.cmpi eq, %1, %18 : vector<1x1x8x1xi32>
    %c1_i32 = arith.constant 1 : i32
    %20 = vector.broadcast %c1_i32 : i32 to vector<1x1x8x1xi32>
    %21 = arith.cmpi eq, %1, %20 : vector<1x1x8x1xi32>
    %cst_7 = arith.constant 0.000000e+00 : f32
    %22 = vector.shape_cast %21 : vector<1x1x8x1xi1> to vector<1x1x8x1xi1>
    %23 = vector.broadcast %22 : vector<1x1x8x1xi1> to vector<1x1x8x128xi1>
    %24 = vector.shape_cast %17 : vector<1x128xf32> to vector<1x1x1x128xf32>
    %25 = vector.broadcast %24 : vector<1x1x1x128xf32> to vector<1x1x8x128xf32>
    %26 = vector.broadcast %cst_7 : f32 to vector<1x1x8x128xf32>
    %27 = arith.select %23, %25, %26 : vector<1x1x8x128xi1>, vector<1x1x8x128xf32>
    %28 = vector.shape_cast %19 : vector<1x1x8x1xi1> to vector<1x1x8x1xi1>
    %29 = vector.broadcast %28 : vector<1x1x8x1xi1> to vector<1x1x8x128xi1>
    %30 = vector.shape_cast %16 : vector<1x128xf32> to vector<1x1x1x128xf32>
    %31 = vector.broadcast %30 : vector<1x1x1x128xf32> to vector<1x1x8x128xf32>
    %32 = arith.select %29, %31, %27 : vector<1x1x8x128xi1>, vector<1x1x8x128xf32>
    %c2_i32_8 = arith.constant 2 : i32
    %33 = vector.broadcast %c2_i32_8 : i32 to vector<1x1x8x1xi32>
    %34 = arith.cmpi slt, %1, %33 : vector<1x1x8x1xi32>
    %cst_9 = arith.constant 8.000000e+00 : f32
    %cst_10 = arith.constant 1.000000e+00 : f32
    %35 = vector.broadcast %cst_9 : f32 to vector<1x1x8x1xf32>
    %36 = vector.broadcast %cst_10 : f32 to vector<1x1x8x1xf32>
    %37 = arith.select %34, %35, %36 : vector<1x1x8x1xi1>, vector<1x1x8x1xf32>
    %38 = vector.broadcast %32 : vector<1x1x8x128xf32> to vector<2x3x8x128xf32>
    %39 = arith.addf %15, %38 : vector<2x3x8x128xf32>
    %40 = vector.broadcast %37 : vector<1x1x8x1xf32> to vector<2x3x8x128xf32>
    %41 = arith.mulf %39, %40 : vector<2x3x8x128xf32>
    %42 = tpu.iota {dimensions = array<i32: 1>} : vector<1x3x1x1xi32>
    %cst_11 = arith.constant 3.300000e+01 : f32
    %43 = vector.broadcast %cst_11 : f32 to vector<1x3x1x1xf32>
    %cst_12 = arith.constant 2.300000e+01 : f32
    %44 = vector.broadcast %cst_12 : f32 to vector<1x3x1x1xf32>
    %c0_i32_13 = arith.constant 0 : i32
    %45 = vector.broadcast %c0_i32_13 : i32 to vector<1x3x1x1xi32>
    %46 = arith.cmpi eq, %42, %45 : vector<1x3x1x1xi32>
    %cst_14 = arith.constant 1.000000e+01 : f32
    %47 = vector.broadcast %cst_14 : f32 to vector<1x3x1x1xf32>
    %48 = arith.select %46, %47, %43 : vector<1x3x1x1xi1>, vector<1x3x1x1xf32>
    %c0_i32_15 = arith.constant 0 : i32
    %49 = vector.broadcast %c0_i32_15 : i32 to vector<1x3x1x1xi32>
    %50 = arith.cmpi eq, %42, %49 : vector<1x3x1x1xi32>
    %cst_16 = arith.constant 1.300000e+01 : f32
    %51 = vector.broadcast %cst_16 : f32 to vector<1x3x1x1xf32>
    %52 = arith.select %50, %51, %44 : vector<1x3x1x1xi1>, vector<1x3x1x1xf32>
    %c1_i32_17 = arith.constant 1 : i32
    %53 = vector.broadcast %c1_i32_17 : i32 to vector<1x3x1x1xi32>
    %54 = arith.cmpi eq, %42, %53 : vector<1x3x1x1xi32>
    %cst_18 = arith.constant 1.600000e+01 : f32
    %55 = vector.broadcast %cst_18 : f32 to vector<1x3x1x1xf32>
    %56 = arith.select %54, %55, %48 : vector<1x3x1x1xi1>, vector<1x3x1x1xf32>
    %c1_i32_19 = arith.constant 1 : i32
    %57 = vector.broadcast %c1_i32_19 : i32 to vector<1x3x1x1xi32>
    %58 = arith.cmpi eq, %42, %57 : vector<1x3x1x1xi32>
    %cst_20 = arith.constant 3.000000e+01 : f32
    %59 = vector.broadcast %cst_20 : f32 to vector<1x3x1x1xf32>
    %60 = arith.select %58, %59, %52 : vector<1x3x1x1xi1>, vector<1x3x1x1xf32>
    %c2_i32_21 = arith.constant 2 : i32
    %61 = vector.broadcast %c2_i32_21 : i32 to vector<1x1x8x1xi32>
    %62 = arith.cmpi eq, %1, %61 : vector<1x1x8x1xi32>
    %c3_i32_22 = arith.constant 3 : i32
    %63 = vector.broadcast %c3_i32_22 : i32 to vector<1x1x8x1xi32>
    %64 = arith.cmpi eq, %1, %63 : vector<1x1x8x1xi32>
    %cst_23 = arith.constant 1.000000e+00 : f32
    %65 = vector.shape_cast %64 : vector<1x1x8x1xi1> to vector<1x1x8x1xi1>
    %66 = vector.broadcast %65 : vector<1x1x8x1xi1> to vector<1x3x8x1xi1>
    %67 = vector.shape_cast %60 : vector<1x3x1x1xf32> to vector<1x3x1x1xf32>
    %68 = vector.broadcast %67 : vector<1x3x1x1xf32> to vector<1x3x8x1xf32>
    %69 = vector.broadcast %cst_23 : f32 to vector<1x3x8x1xf32>
    %70 = arith.select %66, %68, %69 : vector<1x3x8x1xi1>, vector<1x3x8x1xf32>
    %71 = vector.shape_cast %62 : vector<1x1x8x1xi1> to vector<1x1x8x1xi1>
    %72 = vector.broadcast %71 : vector<1x1x8x1xi1> to vector<1x3x8x1xi1>
    %73 = vector.shape_cast %56 : vector<1x3x1x1xf32> to vector<1x3x1x1xf32>
    %74 = vector.broadcast %73 : vector<1x3x1x1xf32> to vector<1x3x8x1xf32>
    %75 = arith.select %72, %74, %70 : vector<1x3x8x1xi1>, vector<1x3x8x1xf32>
    %76 = vector.broadcast %75 : vector<1x3x8x1xf32> to vector<2x3x8x128xf32>
    %77 = arith.mulf %12, %76 : vector<2x3x8x128xf32>
    %78 = vector.shape_cast %6 : vector<1x1x8x1xi1> to vector<1x1x8x1xi1>
    %79 = vector.broadcast %78 : vector<1x1x8x1xi1> to vector<2x3x8x128xi1>
    %80 = arith.select %79, %77, %41 : vector<2x3x8x128xi1>, vector<2x3x8x128xf32>
    %81 = tpu.transpose %80, [0, 1, 3, 2] : vector<2x3x8x128xf32> -> vector<2x3x128x8xf32>
    %c0_24 = arith.constant 0 : index
    %c0_25 = arith.constant 0 : index
    %c0_26 = arith.constant 0 : index
    %c0_27 = arith.constant 0 : index
    %82 = vector.load %arg4[%c0_24, %c0_25, %c0_26, %c0_27] : memref<2x3x128x8xf32, #tpu.memory_space<vmem>>, vector<2x3x128x8xf32>
    tpu.vector_store %arg4[%c0_24, %c0_25, %c0_26, %c0_27], %81 {strides = array<i32>} : memref<2x3x128x8xf32, #tpu.memory_space<vmem>>, vector<2x3x128x8xf32>,
    return
  }
  func.func @transform_0(%arg0: i32, %arg1: i32) -> (i32, i32) {
    %c0_i32 = arith.constant 0 : i32
    %c0_i32_0 = arith.constant 0 : i32
    return %c0_i32, %arg1 : i32, i32
  }
  func.func @transform_1(%arg0: i32, %arg1: i32) -> (i32, i32, i32, i32) {
    %c0_i32 = arith.constant 0 : i32
    %c0_i32_0 = arith.constant 0 : i32
    %c0_i32_1 = arith.constant 0 : i32
    return %arg0, %c0_i32, %c0_i32_0, %arg1 : i32, i32, i32, i32
  }
  func.func @transform_2(%arg0: i32, %arg1: i32) -> (i32, i32, i32, i32) {
    %c0_i32 = arith.constant 0 : i32
    %c0_i32_0 = arith.constant 0 : i32
    %c0_i32_1 = arith.constant 0 : i32
    return %arg0, %c0_i32, %arg1, %c0_i32_0 : i32, i32, i32, i32
  }
}

module attributes {stable_mosaic.version = 11 : i64} {
  func.func @_yolo_kernel(%arg0: i32, %arg1: i32, %arg2: memref<2x128xf32, #tpu.memory_space<vmem>>, %arg3: memref<2x3x8x128xf32, #tpu.memory_space<vmem>>, %arg4: memref<2x3x8x128xf32, #tpu.memory_space<vmem>>) attributes {dimension_semantics = [#tpu.dimension_semantics<parallel>, #tpu.dimension_semantics<parallel>], iteration_bounds = array<i64: 1, 2>, scalar_prefetch = 0 : i64, scratch_operands = 0 : i64, tpu.core_type = #tpu.core_type<tc>, window_params = [{transform_indices = @transform_0, window_bounds = array<i64: 2, 128>}, {transform_indices = @transform_1, window_bounds = array<i64: 2, 3, 8, 128>}, {transform_indices = @transform_2, window_bounds = array<i64: 2, 3, 8, 128>}]} {
    %c0 = arith.constant 0 : index
    %c0_0 = arith.constant 0 : index
    %c0_1 = arith.constant 0 : index
    %c0_2 = arith.constant 0 : index
    %0 = vector.load %arg3[%c0, %c0_0, %c0_1, %c0_2] : memref<2x3x8x128xf32, #tpu.memory_space<vmem>>, vector<2x3x8x128xf32>
    %1 = tpu.iota {dimensions = array<i32: 2>} : vector<1x1x8x1xi32>
    %c2_i32 = arith.constant 2 : i32
    %2 = vector.broadcast %c2_i32 : i32 to vector<1x1x8x1xi32>
    %3 = arith.cmpi eq, %1, %2 : vector<1x1x8x1xi32>
    %c3_i32 = arith.constant 3 : i32
    %4 = vector.broadcast %c3_i32 : i32 to vector<1x1x8x1xi32>
    %5 = arith.cmpi eq, %1, %4 : vector<1x1x8x1xi32>
    %6 = arith.ori %3, %5 : vector<1x1x8x1xi1>
    %cst = arith.constant 0.000000e+00 : f32
    %7 = vector.broadcast %cst : f32 to vector<2x3x8x128xf32>
    %8 = arith.subf %7, %0 : vector<2x3x8x128xf32>
    %9 = vector.shape_cast %6 : vector<1x1x8x1xi1> to vector<1x1x8x1xi1>
    %10 = vector.broadcast %9 : vector<1x1x8x1xi1> to vector<2x3x8x128xi1>
    %11 = arith.select %10, %0, %8 : vector<2x3x8x128xi1>, vector<2x3x8x128xf32>
    %12 = math.exp %11 : vector<2x3x8x128xf32>
    %cst_3 = arith.constant 1.000000e+00 : f32
    %13 = vector.broadcast %cst_3 : f32 to vector<2x3x8x128xf32>
    %14 = arith.addf %13, %12 : vector<2x3x8x128xf32>
    %15 = tpu.reciprocal %14 {approx = true} : vector<2x3x8x128xf32> -> vector<2x3x8x128xf32>
    %c0_4 = arith.constant 0 : index
    %c0_5 = arith.constant 0 : index
    %16 = vector.load %arg2[%c0_4, %c0_5] : memref<2x128xf32, #tpu.memory_space<vmem>>, vector<1x128xf32>
    %c1 = arith.constant 1 : index
    %c0_6 = arith.constant 0 : index
    %17 = vector.load %arg2[%c1, %c0_6] : memref<2x128xf32, #tpu.memory_space<vmem>>, vector<1x128xf32>
    %c0_i32 = arith.constant 0 : i32
    %18 = vector.broadcast %c0_i32 : i32 to vector<1x1x8x1xi32>
    %19 = arith.cmpi eq, %1, %18 : vector<1x1x8x1xi32>
    %c1_i32 = arith.constant 1 : i32
    %20 = vector.broadcast %c1_i32 : i32 to vector<1x1x8x1xi32>
    %21 = arith.cmpi eq, %1, %20 : vector<1x1x8x1xi32>
    %cst_7 = arith.constant 0.000000e+00 : f32
    %22 = vector.shape_cast %21 : vector<1x1x8x1xi1> to vector<1x1x8x1xi1>
    %23 = vector.broadcast %22 : vector<1x1x8x1xi1> to vector<1x1x8x128xi1>
    %24 = vector.shape_cast %17 : vector<1x128xf32> to vector<1x1x1x128xf32>
    %25 = vector.broadcast %24 : vector<1x1x1x128xf32> to vector<1x1x8x128xf32>
    %26 = vector.broadcast %cst_7 : f32 to vector<1x1x8x128xf32>
    %27 = arith.select %23, %25, %26 : vector<1x1x8x128xi1>, vector<1x1x8x128xf32>
    %28 = vector.shape_cast %19 : vector<1x1x8x1xi1> to vector<1x1x8x1xi1>
    %29 = vector.broadcast %28 : vector<1x1x8x1xi1> to vector<1x1x8x128xi1>
    %30 = vector.shape_cast %16 : vector<1x128xf32> to vector<1x1x1x128xf32>
    %31 = vector.broadcast %30 : vector<1x1x1x128xf32> to vector<1x1x8x128xf32>
    %32 = arith.select %29, %31, %27 : vector<1x1x8x128xi1>, vector<1x1x8x128xf32>
    %c2_i32_8 = arith.constant 2 : i32
    %33 = vector.broadcast %c2_i32_8 : i32 to vector<1x1x8x1xi32>
    %34 = arith.cmpi slt, %1, %33 : vector<1x1x8x1xi32>
    %cst_9 = arith.constant 8.000000e+00 : f32
    %cst_10 = arith.constant 1.000000e+00 : f32
    %35 = vector.broadcast %cst_9 : f32 to vector<1x1x8x1xf32>
    %36 = vector.broadcast %cst_10 : f32 to vector<1x1x8x1xf32>
    %37 = arith.select %34, %35, %36 : vector<1x1x8x1xi1>, vector<1x1x8x1xf32>
    %38 = vector.broadcast %32 : vector<1x1x8x128xf32> to vector<2x3x8x128xf32>
    %39 = arith.addf %15, %38 : vector<2x3x8x128xf32>
    %40 = vector.broadcast %37 : vector<1x1x8x1xf32> to vector<2x3x8x128xf32>
    %41 = arith.mulf %39, %40 : vector<2x3x8x128xf32>
    %42 = tpu.iota {dimensions = array<i32: 1>} : vector<1x3x1x1xi32>
    %cst_11 = arith.constant 3.300000e+01 : f32
    %43 = vector.broadcast %cst_11 : f32 to vector<1x3x1x1xf32>
    %cst_12 = arith.constant 2.300000e+01 : f32
    %44 = vector.broadcast %cst_12 : f32 to vector<1x3x1x1xf32>
    %c0_i32_13 = arith.constant 0 : i32
    %45 = vector.broadcast %c0_i32_13 : i32 to vector<1x3x1x1xi32>
    %46 = arith.cmpi eq, %42, %45 : vector<1x3x1x1xi32>
    %cst_14 = arith.constant 1.000000e+01 : f32
    %47 = vector.broadcast %cst_14 : f32 to vector<1x3x1x1xf32>
    %48 = arith.select %46, %47, %43 : vector<1x3x1x1xi1>, vector<1x3x1x1xf32>
    %c0_i32_15 = arith.constant 0 : i32
    %49 = vector.broadcast %c0_i32_15 : i32 to vector<1x3x1x1xi32>
    %50 = arith.cmpi eq, %42, %49 : vector<1x3x1x1xi32>
    %cst_16 = arith.constant 1.300000e+01 : f32
    %51 = vector.broadcast %cst_16 : f32 to vector<1x3x1x1xf32>
    %52 = arith.select %50, %51, %44 : vector<1x3x1x1xi1>, vector<1x3x1x1xf32>
    %c1_i32_17 = arith.constant 1 : i32
    %53 = vector.broadcast %c1_i32_17 : i32 to vector<1x3x1x1xi32>
    %54 = arith.cmpi eq, %42, %53 : vector<1x3x1x1xi32>
    %cst_18 = arith.constant 1.600000e+01 : f32
    %55 = vector.broadcast %cst_18 : f32 to vector<1x3x1x1xf32>
    %56 = arith.select %54, %55, %48 : vector<1x3x1x1xi1>, vector<1x3x1x1xf32>
    %c1_i32_19 = arith.constant 1 : i32
    %57 = vector.broadcast %c1_i32_19 : i32 to vector<1x3x1x1xi32>
    %58 = arith.cmpi eq, %42, %57 : vector<1x3x1x1xi32>
    %cst_20 = arith.constant 3.000000e+01 : f32
    %59 = vector.broadcast %cst_20 : f32 to vector<1x3x1x1xf32>
    %60 = arith.select %58, %59, %52 : vector<1x3x1x1xi1>, vector<1x3x1x1xf32>
    %c2_i32_21 = arith.constant 2 : i32
    %61 = vector.broadcast %c2_i32_21 : i32 to vector<1x1x8x1xi32>
    %62 = arith.cmpi eq, %1, %61 : vector<1x1x8x1xi32>
    %c3_i32_22 = arith.constant 3 : i32
    %63 = vector.broadcast %c3_i32_22 : i32 to vector<1x1x8x1xi32>
    %64 = arith.cmpi eq, %1, %63 : vector<1x1x8x1xi32>
    %cst_23 = arith.constant 1.000000e+00 : f32
    %65 = vector.shape_cast %64 : vector<1x1x8x1xi1> to vector<1x1x8x1xi1>
    %66 = vector.broadcast %65 : vector<1x1x8x1xi1> to vector<1x3x8x1xi1>
    %67 = vector.shape_cast %60 : vector<1x3x1x1xf32> to vector<1x3x1x1xf32>
    %68 = vector.broadcast %67 : vector<1x3x1x1xf32> to vector<1x3x8x1xf32>
    %69 = vector.broadcast %cst_23 : f32 to vector<1x3x8x1xf32>
    %70 = arith.select %66, %68, %69 : vector<1x3x8x1xi1>, vector<1x3x8x1xf32>
    %71 = vector.shape_cast %62 : vector<1x1x8x1xi1> to vector<1x1x8x1xi1>
    %72 = vector.broadcast %71 : vector<1x1x8x1xi1> to vector<1x3x8x1xi1>
    %73 = vector.shape_cast %56 : vector<1x3x1x1xf32> to vector<1x3x1x1xf32>
    %74 = vector.broadcast %73 : vector<1x3x1x1xf32> to vector<1x3x8x1xf32>
    %75 = arith.select %72, %74, %70 : vector<1x3x8x1xi1>, vector<1x3x8x1xf32>
    %76 = vector.broadcast %75 : vector<1x3x8x1xf32> to vector<2x3x8x128xf32>
    %77 = arith.mulf %12, %76 : vector<2x3x8x128xf32>
    %78 = vector.shape_cast %6 : vector<1x1x8x1xi1> to vector<1x1x8x1xi1>
    %79 = vector.broadcast %78 : vector<1x1x8x1xi1> to vector<2x3x8x128xi1>
    %80 = arith.select %79, %77, %41 : vector<2x3x8x128xi1>, vector<2x3x8x128xf32>
    %c0_24 = arith.constant 0 : index
    %c0_25 = arith.constant 0 : index
    %c0_26 = arith.constant 0 : index
    %c0_27 = arith.constant 0 : index
    %81 = vector.load %arg4[%c0_24, %c0_25, %c0_26, %c0_27] : memref<2x3x8x128xf32, #tpu.memory_space<vmem>>, vector<2x3x8x128xf32>
    tpu.vector_store %arg4[%c0_24, %c0_25, %c0_26, %c0_27], %80 {strides = array<i32>} : memref<2x3x8x128xf32, #tpu.memory_space<vmem>>, vector<2x3x8x128xf32>,
    return
  }
  func.func @transform_0(%arg0: i32, %arg1: i32) -> (i32, i32) {
    %c0_i32 = arith.constant 0 : i32
    %c0_i32_0 = arith.constant 0 : i32
    return %c0_i32, %arg1 : i32, i32
  }
  func.func @transform_1(%arg0: i32, %arg1: i32) -> (i32, i32, i32, i32) {
    %c0_i32 = arith.constant 0 : i32
    %c0_i32_0 = arith.constant 0 : i32
    %c0_i32_1 = arith.constant 0 : i32
    return %arg0, %c0_i32, %c0_i32_0, %arg1 : i32, i32, i32, i32
  }
  func.func @transform_2(%arg0: i32, %arg1: i32) -> (i32, i32, i32, i32) {
    %c0_i32 = arith.constant 0 : i32
    %c0_i32_0 = arith.constant 0 : i32
    %c0_i32_1 = arith.constant 0 : i32
    return %arg0, %c0_i32, %c0_i32_0, %arg1 : i32, i32, i32, i32
  }
}

</mosaic_0001>

<bundles_post_ra>
// kernel: tpu_custom_call.1
= control target key start
LH: loop header
LB: loop body
LE: loop exit
PB: predicated region body
PF: predicated region fallthrough
CT: control target
= control target key end

     0   :  { %7 = vsyncpa [#allocation3], 0  ;;  %s1931_s0 = inlined_call_operand.hbm [shape: f32[2,256], index: 0, kind: input, shape index: {}]   ;;  %s1932_s1 = inlined_call_operand.hbm [shape: f32[2,3,8,256], index: 1, kind: input, shape index: {}]   ;;  %s1933_s2 = inlined_call_operand.vmem [shape: f32[2,3,256,8], index: 2, kind: output, shape index: {}]  }
   0x1   :  { %9 = vsyncpa [#allocation3 + $0x1], 0 }
   0x2   :  { %10 = vsyncpa [#allocation5], 0 }
   0x3   :  { %12 = vsyncpa [#allocation5 + $0x1], 0  ;;  %s1373_s9 = smov 0   ;;  %s1375_s10 = smov 0  }
   0x4   :  { %s1377_s11 = smov 0   ;;  %s1379_s12 = smov 0  }
   0x5   :  { %s1381_s13 = smov 0   ;;  %s1383_s14 = smov 0  }
   0x6 LB: > { %s1130_s15 = sadd.s32 4294967295, %s1352_s14   ;;  %s27_s16 = sadd.s32 1, %s1348_s13  ;;  %s1352_s14 = sphi %s1383_s14, %s18_s14   ;;  %s1348_s13 = sphi %s1381_s13, %s1944_s13   ;;  %s1344_s12 = sphi %s1379_s12, %s1943_s12   ;;  %s1340_s11 = sphi %s1377_s11, %s1942_s11   ;;  %s1336_s10 = sphi %s1375_s10, %s1941_s10   ;;  %s1332_s9 = sphi %s1373_s9, %s1940_s9  }
   0x7   : > { %p28_p0 = scmp.ge.s32.totalorder %s27_s16, 2  ;;  %s37_s17 = sadd.s32 1, %s1340_s11 }
   0x8   : > { %p44_p1 = scmp.ne.s32.totalorder %s1340_s11, %s1336_s10  ;;  %p45_p2 = scmp.eq.s32.totalorder %s1352_s14, 0 }
   0x9   : > { %s1946_s16 = smov (%p28_p0, %s27_s16), 0  ;;  %p50_p4 = scmp.ne.s32.totalorder %s1336_s10, %s1332_s9 }
   0xa   : > { %p1409_p3 = por %p45_p2, %p44_p1  ;;  %s34_s19 = ssub.s32 %s1348_s13, %s1946_s16 }
   0xb   : > { %p51_p5 = scmp.eq.s32.totalorder %s1130_s15, 0  ;;  %p35_p6 = scmp.eq.s32.totalorder %s34_s19, 0 }
   0xc   : > { %p104_p7 = scmp.eq.s32.totalorder %s1130_s15, 1  ;;  %p1158_p10 = scmp.lt.s32.totalorder %s1352_s14, 2 }
   0xd   : > { %p1416_p8 = por %p51_p5, %p50_p4  ;;  %s1429_s23 = sand.u32 1, %s1340_s11  }
   0xe   : > { %s1421_s21 = scalar_select %p35_p6, %s1340_s11, %s37_s17  }
   0xf   : > { %p1423_p9 = por %p104_p7, %p44_p1  ;;  %s1135_s24 = sshll.u32 %s1348_s13, 1 }
  0x10   : > { %s1134_s25 = sshll.u32 %s1429_s23, 1  ;;  %s138_s28 = scalar_lea.hbm %s1931_s0, %s1135_s24 }
  0x11   : > { %s140_s29 = sshll.u32 %s138_s28, 4  ;;  %s134_s30 = scalar_lea.vmem [#allocation2], %s1134_s25  ;;  %s141_s29 = int_to_ptr.hbm [resolvable:$true] %s140_s29 }
  0x12   : > { %s142_s3 = sshll.u32 %s134_s30, 4  ;;  %p1438_p11 = pnand %p1158_p10, %p1409_p3  ;;  %s143_s3 = int_to_ptr.vmem [resolvable:$true] %s142_s3 }
  0x13   : > { %s1144_s5 = smul.u32 48, %s1429_s23  ;;  %s1136_s6 = sshll.u32 %s1348_s13, 3 }
  0x14   : > { %p1137_p12 = scmp.ge.s32.totalorder %s1352_s14, 1  ;;  %s131_s7 = scalar_lea.sflag [#allocation3], %s1429_s23 }
  0x15   : > { %1154 = dma.hbm_to_vmem [thread:$0]  (!%p1438_p11), %s141_s29, 32, %s143_s3, %s131_s7  }
  0x16   : > { %p171_p13 = scmp.lt.s32.totalorder %s1352_s14, 3  ;;  %s160_s15 = scalar_lea.hbm %s1932_s1, %s1136_s6 }
  0x17   : > { %s153_s17 = scalar_lea.vmem [#allocation4], %s1144_s5  ;;  %s161_s18 = sshll.u32 %s160_s15, 4  ;;  %s162_s18 = int_to_ptr.hbm [resolvable:$true] %s161_s18 }
  0x18   : > { %s163_s19 = sshll.u32 %s153_s17, 4  ;;  %p172_p0 = pnand %p1137_p12, %p171_p13  ;;  %s164_s19 = int_to_ptr.vmem [resolvable:$true] %s163_s19 }
  0x19   : > { %s150_s24 = scalar_lea.sflag [#allocation5], %s1429_s23  ;;  %s1354_s25 = smov 256  }
  0x1a   : > { %s1355_s26 = smov 128   ;;  %s1356_s27 = smov 8  }
  0x1b   : > { %1157 = dma.hbm_to_vmem [thread:$0]  (!%p1438_p11), %s162_s18, 768, %s164_s19, %s150_s24, %s1354_s25, %s1355_s26, %s1356_s27  }
  0x1c   : > { %175 = sbr.rel (%p172_p0) target bundleno = 492 (0x1ec), region = 28  ;;  %s1456_s28 = sand.u32 (!%p172_p0), 1, %s1336_s10  }
  0x1d   : > { %s1138_s29 = sshll.u32 (!%p172_p0), %s1456_s28, 1  ;;  %s178_s30 = scalar_lea.sflag (!%p172_p0), [#allocation3], %s1456_s28 }
  0x1e   : > { %s1460_s3 = scalar_lea.vmem (!%p172_p0), [#allocation2], %s1138_s29 }
  0x21   : > { %1323 = dma.done.wait (%p1416_p8), %s178_s30, 32  }
  0x22   : > { %1325 = vsyncadd (%p1416_p8), %s178_s30, 4294967264  ;;  %s1145_s23 = smul.u32 48, %s1456_s28  ;;  %s188_s4 = scalar_lea.sflag [#allocation5], %s1456_s28 }
  0x24   : > { %s1468_s5 = scalar_lea.vmem [#allocation4], %s1145_s23 }
  0x25   : > { %1327 = dma.done.wait (%p1416_p8), %s188_s4, 768  }
  0x26   : > { %1329 = vsyncadd (%p1416_p8), %s188_s4, 4294966528  ;;  %v226_v0 = vlaneseq  ;;  %v222_v3 = vld [vmem:[%s1468_s5 + $0x10] sm:$0xff]  ;;  %v220_v5 = vld [vmem:[%s1468_s5] sm:$0xff]  ;;  %v1357_v24 = vmov 1.0   ;;  %s1146_s20 = smul.u32 768, %s1456_s28  ;;  %vm509_vm6 = vcmask 64512  }
  0x27   : > { %v233_v4 = vsub.f32 0.0, %v222_v3  ;;  %v231_v6 = vsub.f32 0.0, %v220_v5  ;;  %v224_v7 = vld [vmem:[%s1468_s5 + $0x20] sm:$0xff]  ;;  %v1212_v16 = vld [vmem:[%s1460_s3 + $0x1] ss:$0 sm:$0xff]  ;;  %s1143_s7 = sshll.u32 (%p1423_p9), %s1344_s12, 7 }
  0x28   : > { %v227_v1 = vshrl.u32 %v226_v0, 7  ;;  %v235_v9 = vsub.f32 0.0, %v224_v7  ;;  %v1213_v21 = vld [vmem:[%s1460_s3] ss:$0 sm:$0xff]  ;;  %s1519_s6 = scalar_lea.vmem [#allocation6], %s1146_s20  ;;  %s1721_s15 = scalar_lea.vmem (%p1423_p9), %s1933_s2, %s1143_s7 }
  0x29   : > { %v223_v48 = vld [vmem:[%s1468_s5 + $0x18] sm:$0xff]  ;;  %v221_v49 = vld [vmem:[%s1468_s5 + $0x8] sm:$0xff] }
  0x2a   : > { %vm228_vm0 = vcmp.eq.s32.totalorder %v227_v1, 2  ;;  %vm229_vm1 = vcmp.eq.s32.totalorder %v227_v1, 3  ;;  %vm272_vm3 = vcmp.eq.s32.totalorder %v227_v1, 1  ;;  %vm271_vm4 = vcmp.eq.s32.totalorder %v227_v1, 0  ;;  %v225_v50 = vld [vmem:[%s1468_s5 + $0x28] sm:$0xff] }
  0x2b   : > { %vm1476_vm2 = vmor %vm228_vm0, %vm229_vm1  ;;  %v276_v23 = vsel %vm272_vm3, %v1212_v16, 0.0  ;;  %v299_v25 = vsel %vm229_vm1, 23.0, %v1357_v24  ;;  %v297_v26 = vsel %vm229_vm1, 13.0, %v1357_v24  ;;  %vm281_vm5 = vcmp.lt.s32.totalorder %v227_v1, 2 }
  0x2c   : > { %v241_v8 = vsel %vm1476_vm2, %v222_v3, %v233_v4  ;;  %v239_v11 = vsel %vm1476_vm2, %v220_v5, %v231_v6  ;;  %v243_v13 = vsel %vm1476_vm2, %v224_v7, %v235_v9  ;;  %v298_v27 = vsel %vm229_vm1, 30.0, %v1357_v24 }
  0x2d   : > { %v249_v10 = vmul.f32 1.442695, %v241_v8  ;;  %v245_v12 = vmul.f32 1.442695, %v239_v11  ;;  %v253_v14 = vmul.f32 1.442695, %v243_v13  ;;  %v280_v28 = vsel %vm271_vm4, %v1213_v21, %v276_v23 }
  0x2e   : > { %v304_v29 = vsel %vm228_vm0, 33.0, %v299_v25  ;;  %v302_v30 = vsel %vm228_vm0, 10.0, %v297_v26  ;;  %v282_v32 = vsel %vm281_vm5, 8.0, %v1357_v24  ;;  %v303_v33 = vsel %vm228_vm0, 16.0, %v298_v27 }
  0x2f   : > { %1214 = vpow2.f32 %v249_v10  ;;  %v234_v51 = vsub.f32 0.0, %v223_v48  ;;  %v232_v52 = vsub.f32 0.0, %v221_v49  ;;  %v236_v53 = vsub.f32 0.0, %v225_v50 }
  0x30   : > { %1216 = vpow2.f32 %v245_v12 }
  0x31   : > { %1218 = vpow2.f32 %v253_v14  ;;  %v242_v54 = vsel %vm1476_vm2, %v223_v48, %v234_v51  ;;  %v240_v55 = vsel %vm1476_vm2, %v221_v49, %v232_v52  ;;  %v244_v56 = vsel %vm1476_vm2, %v225_v50, %v236_v53 }
  0x32   : > { %v251_v57 = vmul.f32 1.442695, %v242_v54  ;;  %v247_v58 = vmul.f32 1.442695, %v240_v55  ;;  %v255_v59 = vmul.f32 1.442695, %v244_v56 }
  0x35   : > { %v1215_v15 = vpop.eup %1214 }
  0x36   : > { %v1217_v17 = vpop.eup %1216  ;;  %v259_v18 = vadd.f32 1.0, %v1215_v15  ;;  %v307_v36 = vmul.f32 %v1215_v15, %v304_v29 }
  0x37   : > { %v1219_v19 = vpop.eup %1218  ;;  %v257_v20 = vadd.f32 1.0, %v1217_v17  ;;  %v305_v39 = vmul.f32 %v1217_v17, %v302_v30 }
  0x38   : > { %1220 = vrcp.f32 %v259_v18  ;;  %v261_v22 = vadd.f32 1.0, %v1219_v19  ;;  %v309_v42 = vmul.f32 %v1219_v19, %v303_v33 }
  0x39   : > { %1222 = vrcp.f32 %v257_v20 }
  0x3a   : > { %1224 = vrcp.f32 %v261_v22 }
  0x3b   : > { %1226 = vpow2.f32 %v251_v57 }
  0x3c   : > { %1228 = vpow2.f32 %v247_v58 }
  0x3d   : > { %1230 = vpow2.f32 %v255_v59 }
  0x3e   : > { %v1221_v31 = vpop.eup %1220 }
  0x3f   : > { %v1223_v34 = vpop.eup %1222  ;;  %v285_v35 = vadd.f32 %v1221_v31, %v280_v28 }
  0x40   : > { %v1225_v37 = vpop.eup %1224  ;;  %v283_v38 = vadd.f32 %v1223_v34, %v280_v28 }
  0x41   : > { %v291_v40 = vmul.f32 %v285_v35, %v282_v32  ;;  %v287_v41 = vadd.f32 %v1225_v37, %v280_v28  ;;  %v1227_v60 = vpop.eup %1226 }
  0x42   : > { %v289_v43 = vmul.f32 %v283_v38, %v282_v32  ;;  %v1229_v61 = vpop.eup %1228  ;;  %v260_v63 = vadd.f32 1.0, %v1227_v60  ;;  %v308_v10 = vmul.f32 %v1227_v60, %v302_v30 }
  0x43   : > { %v313_v44 = vsel %vm1476_vm2, %v307_v36, %v291_v40  ;;  %v293_v45 = vmul.f32 %v287_v41, %v282_v32  ;;  %v1231_v62 = vpop.eup %1230  ;;  %v258_v0 = vadd.f32 1.0, %v1229_v61  ;;  %v306_v12 = vmul.f32 %v1229_v61, %v303_v33 }
  0x44   : > { %381 = vxpose.xlu1.b32.start.end [1/1] (short) %v313_v44, 128  ;;  %v311_v46 = vsel %vm1476_vm2, %v305_v39, %v289_v43  ;;  %v262_v1 = vadd.f32 1.0, %v1231_v62  ;;  %1232 = vrcp.f32 %v260_v63  ;;  %v310_v14 = vmul.f32 %v1231_v62, %v304_v29 }
  0x45   : > { %317 = vxpose.xlu0.b32.start.end [1/1] (short) %v311_v46, 128  ;;  %v315_v47 = vsel %vm1476_vm2, %v309_v42, %v293_v45  ;;  %1234 = vrcp.f32 %v258_v0 }
  0x46   : > { %445 = vxpose.xlu2.b32.start.end [1/1] (short) %v315_v47, 128  ;;  %1236 = vrcp.f32 %v262_v1 }
  0x4a   : > { %v1233_v3 = vpop.eup %1232 }
  0x4b   : > { %v1235_v4 = vpop.eup %1234  ;;  %v286_v6 = vadd.f32 %v1233_v3, %v280_v28 }
  0x4c   : > { %v1237_v5 = vpop.eup %1236  ;;  %v284_v7 = vadd.f32 %v1235_v4, %v280_v28 }
  0x4d   : > { %v288_v8 = vadd.f32 %v1237_v5, %v280_v28  ;;  %v292_v9 = vmul.f32 %v286_v6, %v282_v32 }
  0x4e   : > { %v290_v11 = vmul.f32 %v284_v7, %v282_v32 }
  0x4f   : > { %v294_v13 = vmul.f32 %v288_v8, %v282_v32  ;;  %v314_v15 = vsel %vm1476_vm2, %v308_v10, %v292_v9 }
  0x50   : > { %v312_v16 = vsel %vm1476_vm2, %v306_v12, %v290_v11 }
  0x51   : > { %v316_v17 = vsel %vm1476_vm2, %v310_v14, %v294_v13 }
  0xc4   : > { %413 = vxpose.xlu1.b32.start.end [1/1] (short) %v314_v15, 128 }
  0xc5   : > { %349 = vxpose.xlu0.b32.start.end [1/1] (short) %v312_v16, 128 }
  0xc6   : > { %477 = vxpose.xlu2.b32.start.end [1/1] (short) %v316_v17, 128 }
  0xdf   : > { %v461_v18 = vpop.trf.xlu2 }
  0xe0   : > { %574 = vst.msk [vmem:[%s1519_s6 + $0x200] sm:$0xff] %vm509_vm6, %v461_v18 }
  0xe7   : > { %v462_v2 = vpop.trf.xlu2 }
  0xe8   : > { %v397_v19 = vpop.trf.xlu1  ;;  %575 = vst.msk [vmem:[%s1519_s6 + $0x208] sm:$0xff] %vm509_vm6, %v462_v2 }
  0xe9   : > { %542 = vst.msk [vmem:[%s1519_s6 + $0x100] sm:$0xff] %vm509_vm6, %v397_v19  ;;  %v333_v20 = vpop.trf.xlu0 }
  0xea   : > { %510 = vst.msk [vmem:[%s1519_s6] sm:$0xff] %vm509_vm6, %v333_v20 }
  0xef   : > { %v463_v21 = vpop.trf.xlu2 }
  0xf0   : > { %v398_v22 = vpop.trf.xlu1  ;;  %576 = vst.msk [vmem:[%s1519_s6 + $0x210] sm:$0xff] %vm509_vm6, %v463_v21 }
  0xf1   : > { %543 = vst.msk [vmem:[%s1519_s6 + $0x108] sm:$0xff] %vm509_vm6, %v398_v22  ;;  %v334_v23 = vpop.trf.xlu0 }
  0xf2   : > { %511 = vst.msk [vmem:[%s1519_s6 + $0x8] sm:$0xff] %vm509_vm6, %v334_v23 }
  0xf7   : > { %v464_v24 = vpop.trf.xlu2 }
  0xf8   : > { %v399_v25 = vpop.trf.xlu1  ;;  %577 = vst.msk [vmem:[%s1519_s6 + $0x218] sm:$0xff] %vm509_vm6, %v464_v24 }
  0xf9   : > { %544 = vst.msk [vmem:[%s1519_s6 + $0x110] sm:$0xff] %vm509_vm6, %v399_v25  ;;  %v335_v26 = vpop.trf.xlu0 }
  0xfa   : > { %512 = vst.msk [vmem:[%s1519_s6 + $0x10] sm:$0xff] %vm509_vm6, %v335_v26 }
  0xff   : > { %v465_v27 = vpop.trf.xlu2 }
 0x100   : > { %v400_v28 = vpop.trf.xlu1  ;;  %578 = vst.msk [vmem:[%s1519_s6 + $0x220] sm:$0xff] %vm509_vm6, %v465_v27 }
 0x101   : > { %545 = vst.msk [vmem:[%s1519_s6 + $0x118] sm:$0xff] %vm509_vm6, %v400_v28  ;;  %v336_v29 = vpop.trf.xlu0 }
 0x102   : > { %513 = vst.msk [vmem:[%s1519_s6 + $0x18] sm:$0xff] %vm509_vm6, %v336_v29 }
 0x107   : > { %v466_v30 = vpop.trf.xlu2 }
 0x108   : > { %v401_v31 = vpop.trf.xlu1  ;;  %579 = vst.msk [vmem:[%s1519_s6 + $0x228] sm:$0xff] %vm509_vm6, %v466_v30 }
 0x109   : > { %546 = vst.msk [vmem:[%s1519_s6 + $0x120] sm:$0xff] %vm509_vm6, %v401_v31  ;;  %v337_v32 = vpop.trf.xlu0 }
 0x10a   : > { %514 = vst.msk [vmem:[%s1519_s6 + $0x20] sm:$0xff] %vm509_vm6, %v337_v32 }
 0x10f   : > { %v467_v33 = vpop.trf.xlu2 }
 0x110   : > { %v402_v34 = vpop.trf.xlu1  ;;  %580 = vst.msk [vmem:[%s1519_s6 + $0x230] sm:$0xff] %vm509_vm6, %v467_v33 }
 0x111   : > { %547 = vst.msk [vmem:[%s1519_s6 + $0x128] sm:$0xff] %vm509_vm6, %v402_v34  ;;  %v338_v35 = vpop.trf.xlu0 }
 0x112   : > { %515 = vst.msk [vmem:[%s1519_s6 + $0x28] sm:$0xff] %vm509_vm6, %v338_v35 }
 0x117   : > { %v468_v36 = vpop.trf.xlu2 }
 0x118   : > { %v403_v37 = vpop.trf.xlu1  ;;  %581 = vst.msk [vmem:[%s1519_s6 + $0x238] sm:$0xff] %vm509_vm6, %v468_v36 }
 0x119   : > { %548 = vst.msk [vmem:[%s1519_s6 + $0x130] sm:$0xff] %vm509_vm6, %v403_v37  ;;  %v339_v38 = vpop.trf.xlu0 }
 0x11a   : > { %516 = vst.msk [vmem:[%s1519_s6 + $0x30] sm:$0xff] %vm509_vm6, %v339_v38 }
 0x11f   : > { %v469_v39 = vpop.trf.xlu2 }
 0x120   : > { %v404_v40 = vpop.trf.xlu1  ;;  %582 = vst.msk [vmem:[%s1519_s6 + $0x240] sm:$0xff] %vm509_vm6, %v469_v39 }
 0x121   : > { %549 = vst.msk [vmem:[%s1519_s6 + $0x138] sm:$0xff] %vm509_vm6, %v404_v40  ;;  %v340_v41 = vpop.trf.xlu0 }
 0x122   : > { %517 = vst.msk [vmem:[%s1519_s6 + $0x38] sm:$0xff] %vm509_vm6, %v340_v41 }
 0x127   : > { %v470_v42 = vpop.trf.xlu2 }
 0x128   : > { %v405_v43 = vpop.trf.xlu1  ;;  %583 = vst.msk [vmem:[%s1519_s6 + $0x248] sm:$0xff] %vm509_vm6, %v470_v42 }
 0x129   : > { %550 = vst.msk [vmem:[%s1519_s6 + $0x140] sm:$0xff] %vm509_vm6, %v405_v43  ;;  %v341_v44 = vpop.trf.xlu0 }
 0x12a   : > { %518 = vst.msk [vmem:[%s1519_s6 + $0x40] sm:$0xff] %vm509_vm6, %v341_v44 }
 0x12f   : > { %v471_v45 = vpop.trf.xlu2 }
 0x130   : > { %v406_v46 = vpop.trf.xlu1  ;;  %584 = vst.msk [vmem:[%s1519_s6 + $0x250] sm:$0xff] %vm509_vm6, %v471_v45 }
 0x131   : > { %551 = vst.msk [vmem:[%s1519_s6 + $0x148] sm:$0xff] %vm509_vm6, %v406_v46  ;;  %v342_v47 = vpop.trf.xlu0 }
 0x132   : > { %519 = vst.msk [vmem:[%s1519_s6 + $0x48] sm:$0xff] %vm509_vm6, %v342_v47 }
 0x137   : > { %v472_v48 = vpop.trf.xlu2 }
 0x138   : > { %v407_v49 = vpop.trf.xlu1  ;;  %585 = vst.msk [vmem:[%s1519_s6 + $0x258] sm:$0xff] %vm509_vm6, %v472_v48 }
 0x139   : > { %552 = vst.msk [vmem:[%s1519_s6 + $0x150] sm:$0xff] %vm509_vm6, %v407_v49  ;;  %v343_v50 = vpop.trf.xlu0  ;;  %v837_v49 = vld [vmem:[%s1519_s6] sm:$0xff] (%p1423_p9) }
 0x13a   : > { %520 = vst.msk [vmem:[%s1519_s6 + $0x50] sm:$0xff] %vm509_vm6, %v343_v50  ;;  %v839_v50 = vld [vmem:[%s1519_s6 + $0x8] sm:$0xff] (%p1423_p9) }
 0x13b   : > { %838 = vst [vmem:[%s1721_s15] sm:$0xff] (%p1423_p9), %v837_v49  ;;  %v965_v49 = vld [vmem:[%s1519_s6 + $0x200] sm:$0xff] (%p1423_p9) }
 0x13c   : > { %840 = vst [vmem:[%s1721_s15 + $0x8] sm:$0xff] (%p1423_p9), %v839_v50  ;;  %v967_v50 = vld [vmem:[%s1519_s6 + $0x208] sm:$0xff] (%p1423_p9) }
 0x13d   : > { %966 = vst [vmem:[%s1721_s15 + $0x400] sm:$0xff] (%p1423_p9), %v965_v49 }
 0x13e   : > { %968 = vst [vmem:[%s1721_s15 + $0x408] sm:$0xff] (%p1423_p9), %v967_v50 }
 0x13f   : > { %v473_v51 = vpop.trf.xlu2 }
 0x140   : > { %v408_v52 = vpop.trf.xlu1  ;;  %586 = vst.msk [vmem:[%s1519_s6 + $0x260] sm:$0xff] %vm509_vm6, %v473_v51  ;;  %v841_v51 = vld [vmem:[%s1519_s6 + $0x10] sm:$0xff] (%p1423_p9) }
 0x141   : > { %553 = vst.msk [vmem:[%s1519_s6 + $0x158] sm:$0xff] %vm509_vm6, %v408_v52  ;;  %v344_v53 = vpop.trf.xlu0  ;;  %v843_v52 = vld [vmem:[%s1519_s6 + $0x18] sm:$0xff] (%p1423_p9) }
 0x142   : > { %521 = vst.msk [vmem:[%s1519_s6 + $0x58] sm:$0xff] %vm509_vm6, %v344_v53  ;;  %v845_v53 = vld [vmem:[%s1519_s6 + $0x20] sm:$0xff] (%p1423_p9) }
 0x143   : > { %842 = vst [vmem:[%s1721_s15 + $0x10] sm:$0xff] (%p1423_p9), %v841_v51  ;;  %v969_v51 = vld [vmem:[%s1519_s6 + $0x210] sm:$0xff] (%p1423_p9) }
 0x144   : > { %844 = vst [vmem:[%s1721_s15 + $0x18] sm:$0xff] (%p1423_p9), %v843_v52  ;;  %v971_v52 = vld [vmem:[%s1519_s6 + $0x218] sm:$0xff] (%p1423_p9) }
 0x145   : > { %846 = vst [vmem:[%s1721_s15 + $0x20] sm:$0xff] (%p1423_p9), %v845_v53  ;;  %v973_v53 = vld [vmem:[%s1519_s6 + $0x220] sm:$0xff] (%p1423_p9) }
 0x146   : > { %970 = vst [vmem:[%s1721_s15 + $0x410] sm:$0xff] (%p1423_p9), %v969_v51 }
 0x147   : > { %v474_v54 = vpop.trf.xlu2  ;;  %972 = vst [vmem:[%s1721_s15 + $0x418] sm:$0xff] (%p1423_p9), %v971_v52 }
 0x148   : > { %v409_v55 = vpop.trf.xlu1  ;;  %587 = vst.msk [vmem:[%s1519_s6 + $0x268] sm:$0xff] %vm509_vm6, %v474_v54  ;;  %v847_v54 = vld [vmem:[%s1519_s6 + $0x28] sm:$0xff] (%p1423_p9) }
 0x149   : > { %554 = vst.msk [vmem:[%s1519_s6 + $0x160] sm:$0xff] %vm509_vm6, %v409_v55  ;;  %v345_v56 = vpop.trf.xlu0  ;;  %v849_v55 = vld [vmem:[%s1519_s6 + $0x30] sm:$0xff] (%p1423_p9) }
 0x14a   : > { %522 = vst.msk [vmem:[%s1519_s6 + $0x60] sm:$0xff] %vm509_vm6, %v345_v56  ;;  %v851_v56 = vld [vmem:[%s1519_s6 + $0x38] sm:$0xff] (%p1423_p9) }
 0x14b   : > { %848 = vst [vmem:[%s1721_s15 + $0x28] sm:$0xff] (%p1423_p9), %v847_v54  ;;  %v975_v54 = vld [vmem:[%s1519_s6 + $0x228] sm:$0xff] (%p1423_p9) }
 0x14c   : > { %850 = vst [vmem:[%s1721_s15 + $0x30] sm:$0xff] (%p1423_p9), %v849_v55  ;;  %v977_v55 = vld [vmem:[%s1519_s6 + $0x230] sm:$0xff] (%p1423_p9) }
 0x14d   : > { %852 = vst [vmem:[%s1721_s15 + $0x38] sm:$0xff] (%p1423_p9), %v851_v56  ;;  %v979_v56 = vld [vmem:[%s1519_s6 + $0x238] sm:$0xff] (%p1423_p9) }
 0x14e   : > { %974 = vst [vmem:[%s1721_s15 + $0x420] sm:$0xff] (%p1423_p9), %v973_v53 }
 0x14f   : > { %v475_v57 = vpop.trf.xlu2  ;;  %976 = vst [vmem:[%s1721_s15 + $0x428] sm:$0xff] (%p1423_p9), %v975_v54 }
 0x150   : > { %v410_v58 = vpop.trf.xlu1  ;;  %588 = vst.msk [vmem:[%s1519_s6 + $0x270] sm:$0xff] %vm509_vm6, %v475_v57  ;;  %v853_v57 = vld [vmem:[%s1519_s6 + $0x40] sm:$0xff] (%p1423_p9) }
 0x151   : > { %555 = vst.msk [vmem:[%s1519_s6 + $0x168] sm:$0xff] %vm509_vm6, %v410_v58  ;;  %v346_v59 = vpop.trf.xlu0  ;;  %v855_v58 = vld [vmem:[%s1519_s6 + $0x48] sm:$0xff] (%p1423_p9) }
 0x152   : > { %523 = vst.msk [vmem:[%s1519_s6 + $0x68] sm:$0xff] %vm509_vm6, %v346_v59  ;;  %v857_v59 = vld [vmem:[%s1519_s6 + $0x50] sm:$0xff] (%p1423_p9) }
 0x153   : > { %854 = vst [vmem:[%s1721_s15 + $0x40] sm:$0xff] (%p1423_p9), %v853_v57  ;;  %v981_v57 = vld [vmem:[%s1519_s6 + $0x240] sm:$0xff] (%p1423_p9) }
 0x154   : > { %856 = vst [vmem:[%s1721_s15 + $0x48] sm:$0xff] (%p1423_p9), %v855_v58  ;;  %v983_v58 = vld [vmem:[%s1519_s6 + $0x248] sm:$0xff] (%p1423_p9) }
 0x155   : > { %858 = vst [vmem:[%s1721_s15 + $0x50] sm:$0xff] (%p1423_p9), %v857_v59  ;;  %v985_v59 = vld [vmem:[%s1519_s6 + $0x250] sm:$0xff] (%p1423_p9) }
 0x156   : > { %978 = vst [vmem:[%s1721_s15 + $0x430] sm:$0xff] (%p1423_p9), %v977_v55 }
 0x157   : > { %v476_v60 = vpop.trf.xlu2  ;;  %980 = vst [vmem:[%s1721_s15 + $0x438] sm:$0xff] (%p1423_p9), %v979_v56 }
 0x158   : > { %v411_v61 = vpop.trf.xlu1  ;;  %589 = vst.msk [vmem:[%s1519_s6 + $0x278] sm:$0xff] %vm509_vm6, %v476_v60  ;;  %v859_v60 = vld [vmem:[%s1519_s6 + $0x58] sm:$0xff] (%p1423_p9) }
 0x159   : > { %556 = vst.msk [vmem:[%s1519_s6 + $0x170] sm:$0xff] %vm509_vm6, %v411_v61  ;;  %v347_v62 = vpop.trf.xlu0  ;;  %v861_v61 = vld [vmem:[%s1519_s6 + $0x60] sm:$0xff] (%p1423_p9) }
 0x15a   : > { %524 = vst.msk [vmem:[%s1519_s6 + $0x70] sm:$0xff] %vm509_vm6, %v347_v62  ;;  %v863_v62 = vld [vmem:[%s1519_s6 + $0x68] sm:$0xff] (%p1423_p9) }
 0x15b   : > { %860 = vst [vmem:[%s1721_s15 + $0x58] sm:$0xff] (%p1423_p9), %v859_v60  ;;  %v987_v60 = vld [vmem:[%s1519_s6 + $0x258] sm:$0xff] (%p1423_p9) }
 0x15c   : > { %862 = vst [vmem:[%s1721_s15 + $0x60] sm:$0xff] (%p1423_p9), %v861_v61  ;;  %v989_v61 = vld [vmem:[%s1519_s6 + $0x260] sm:$0xff] (%p1423_p9) }
 0x15d   : > { %864 = vst [vmem:[%s1721_s15 + $0x68] sm:$0xff] (%p1423_p9), %v863_v62  ;;  %v991_v62 = vld [vmem:[%s1519_s6 + $0x268] sm:$0xff] (%p1423_p9) }
 0x15e   : > { %982 = vst [vmem:[%s1721_s15 + $0x440] sm:$0xff] (%p1423_p9), %v981_v57 }
 0x15f   : > { %v493_v63 = vpop.trf.xlu2  ;;  %984 = vst [vmem:[%s1721_s15 + $0x448] sm:$0xff] (%p1423_p9), %v983_v58 }
 0x160   : > { %v412_v0 = vpop.trf.xlu1  ;;  %590 = vst.msk [vmem:[%s1519_s6 + $0x280] sm:$0xff] %vm509_vm6, %v493_v63 }
 0x161   : > { %557 = vst.msk [vmem:[%s1519_s6 + $0x178] sm:$0xff] %vm509_vm6, %v412_v0  ;;  %v348_v1 = vpop.trf.xlu0  ;;  %v865_v63 = vld [vmem:[%s1519_s6 + $0x70] sm:$0xff] (%p1423_p9) }
 0x162   : > { %525 = vst.msk [vmem:[%s1519_s6 + $0x78] sm:$0xff] %vm509_vm6, %v348_v1 }
 0x163   : > { %866 = vst [vmem:[%s1721_s15 + $0x70] sm:$0xff] (%p1423_p9), %v865_v63  ;;  %v993_v63 = vld [vmem:[%s1519_s6 + $0x270] sm:$0xff] (%p1423_p9) }
 0x164   : > { %986 = vst [vmem:[%s1721_s15 + $0x450] sm:$0xff] (%p1423_p9), %v985_v59 }
 0x165   : > { %988 = vst [vmem:[%s1721_s15 + $0x458] sm:$0xff] (%p1423_p9), %v987_v60 }
 0x166   : > { %990 = vst [vmem:[%s1721_s15 + $0x460] sm:$0xff] (%p1423_p9), %v989_v61 }
 0x167   : > { %v494_v3 = vpop.trf.xlu2  ;;  %992 = vst [vmem:[%s1721_s15 + $0x468] sm:$0xff] (%p1423_p9), %v991_v62 }
 0x168   : > { %v429_v4 = vpop.trf.xlu1  ;;  %591 = vst.msk [vmem:[%s1519_s6 + $0x288] sm:$0xff] %vm509_vm6, %v494_v3 }
 0x169   : > { %558 = vst.msk [vmem:[%s1519_s6 + $0x180] sm:$0xff] %vm509_vm6, %v429_v4  ;;  %v365_v5 = vpop.trf.xlu0  ;;  %v867_v0 = vld [vmem:[%s1519_s6 + $0x78] sm:$0xff] (%p1423_p9) }
 0x16a   : > { %526 = vst.msk [vmem:[%s1519_s6 + $0x80] sm:$0xff] %vm509_vm6, %v365_v5 }
 0x16b   : > { %868 = vst [vmem:[%s1721_s15 + $0x78] sm:$0xff] (%p1423_p9), %v867_v0  ;;  %v995_v0 = vld [vmem:[%s1519_s6 + $0x278] sm:$0xff] (%p1423_p9) }
 0x16c   : > { %994 = vst [vmem:[%s1721_s15 + $0x470] sm:$0xff] (%p1423_p9), %v993_v63 }
 0x16d   : > { %996 = vst [vmem:[%s1721_s15 + $0x478] sm:$0xff] (%p1423_p9), %v995_v0 }
 0x16f   : > { %v495_v6 = vpop.trf.xlu2 }
 0x170   : > { %v430_v7 = vpop.trf.xlu1  ;;  %592 = vst.msk [vmem:[%s1519_s6 + $0x290] sm:$0xff] %vm509_vm6, %v495_v6 }
 0x171   : > { %559 = vst.msk [vmem:[%s1519_s6 + $0x188] sm:$0xff] %vm509_vm6, %v430_v7  ;;  %v366_v8 = vpop.trf.xlu0  ;;  %v869_v1 = vld [vmem:[%s1519_s6 + $0x80] sm:$0xff] (%p1423_p9) }
 0x172   : > { %527 = vst.msk [vmem:[%s1519_s6 + $0x88] sm:$0xff] %vm509_vm6, %v366_v8 }
 0x173   : > { %870 = vst [vmem:[%s1721_s15 + $0x100] sm:$0xff] (%p1423_p9), %v869_v1  ;;  %v997_v1 = vld [vmem:[%s1519_s6 + $0x280] sm:$0xff] (%p1423_p9) }
 0x174   : > { %998 = vst [vmem:[%s1721_s15 + $0x500] sm:$0xff] (%p1423_p9), %v997_v1 }
 0x177   : > { %v496_v9 = vpop.trf.xlu2 }
 0x178   : > { %v431_v10 = vpop.trf.xlu1  ;;  %593 = vst.msk [vmem:[%s1519_s6 + $0x298] sm:$0xff] %vm509_vm6, %v496_v9 }
 0x179   : > { %560 = vst.msk [vmem:[%s1519_s6 + $0x190] sm:$0xff] %vm509_vm6, %v431_v10  ;;  %v367_v11 = vpop.trf.xlu0  ;;  %v871_v3 = vld [vmem:[%s1519_s6 + $0x88] sm:$0xff] (%p1423_p9) }
 0x17a   : > { %528 = vst.msk [vmem:[%s1519_s6 + $0x90] sm:$0xff] %vm509_vm6, %v367_v11 }
 0x17b   : > { %872 = vst [vmem:[%s1721_s15 + $0x108] sm:$0xff] (%p1423_p9), %v871_v3  ;;  %v999_v3 = vld [vmem:[%s1519_s6 + $0x288] sm:$0xff] (%p1423_p9) }
 0x17c   : > { %1000 = vst [vmem:[%s1721_s15 + $0x508] sm:$0xff] (%p1423_p9), %v999_v3 }
 0x17f   : > { %v497_v12 = vpop.trf.xlu2 }
 0x180   : > { %v432_v13 = vpop.trf.xlu1  ;;  %594 = vst.msk [vmem:[%s1519_s6 + $0x2a0] sm:$0xff] %vm509_vm6, %v497_v12 }
 0x181   : > { %561 = vst.msk [vmem:[%s1519_s6 + $0x198] sm:$0xff] %vm509_vm6, %v432_v13  ;;  %v368_v14 = vpop.trf.xlu0  ;;  %v873_v4 = vld [vmem:[%s1519_s6 + $0x90] sm:$0xff] (%p1423_p9) }
 0x182   : > { %529 = vst.msk [vmem:[%s1519_s6 + $0x98] sm:$0xff] %vm509_vm6, %v368_v14 }
 0x183   : > { %874 = vst [vmem:[%s1721_s15 + $0x110] sm:$0xff] (%p1423_p9), %v873_v4  ;;  %v1001_v4 = vld [vmem:[%s1519_s6 + $0x290] sm:$0xff] (%p1423_p9) }
 0x184   : > { %1002 = vst [vmem:[%s1721_s15 + $0x510] sm:$0xff] (%p1423_p9), %v1001_v4 }
 0x187   : > { %v498_v15 = vpop.trf.xlu2 }
 0x188   : > { %v433_v16 = vpop.trf.xlu1  ;;  %595 = vst.msk [vmem:[%s1519_s6 + $0x2a8] sm:$0xff] %vm509_vm6, %v498_v15 }
 0x189   : > { %562 = vst.msk [vmem:[%s1519_s6 + $0x1a0] sm:$0xff] %vm509_vm6, %v433_v16  ;;  %v369_v17 = vpop.trf.xlu0  ;;  %v875_v5 = vld [vmem:[%s1519_s6 + $0x98] sm:$0xff] (%p1423_p9) }
 0x18a   : > { %530 = vst.msk [vmem:[%s1519_s6 + $0xa0] sm:$0xff] %vm509_vm6, %v369_v17 }
 0x18b   : > { %876 = vst [vmem:[%s1721_s15 + $0x118] sm:$0xff] (%p1423_p9), %v875_v5  ;;  %v1003_v5 = vld [vmem:[%s1519_s6 + $0x298] sm:$0xff] (%p1423_p9) }
 0x18c   : > { %1004 = vst [vmem:[%s1721_s15 + $0x518] sm:$0xff] (%p1423_p9), %v1003_v5 }
 0x18f   : > { %v499_v18 = vpop.trf.xlu2 }
 0x190   : > { %v434_v2 = vpop.trf.xlu1  ;;  %596 = vst.msk [vmem:[%s1519_s6 + $0x2b0] sm:$0xff] %vm509_vm6, %v499_v18  ;;  %v901_v18 = vld [vmem:[%s1519_s6 + $0x100] sm:$0xff] (%p1423_p9) }
 0x191   : > { %563 = vst.msk [vmem:[%s1519_s6 + $0x1a8] sm:$0xff] %vm509_vm6, %v434_v2  ;;  %v370_v19 = vpop.trf.xlu0  ;;  %v877_v6 = vld [vmem:[%s1519_s6 + $0xa0] sm:$0xff] (%p1423_p9)  ;;  %v903_v2 = vld [vmem:[%s1519_s6 + $0x108] sm:$0xff] (%p1423_p9) }
 0x192   : > { %531 = vst.msk [vmem:[%s1519_s6 + $0xa8] sm:$0xff] %vm509_vm6, %v370_v19  ;;  %v905_v19 = vld [vmem:[%s1519_s6 + $0x110] sm:$0xff] (%p1423_p9) }
 0x193   : > { %878 = vst [vmem:[%s1721_s15 + $0x120] sm:$0xff] (%p1423_p9), %v877_v6  ;;  %v1005_v6 = vld [vmem:[%s1519_s6 + $0x2a0] sm:$0xff] (%p1423_p9) }
 0x194   : > { %902 = vst [vmem:[%s1721_s15 + $0x200] sm:$0xff] (%p1423_p9), %v901_v18 }
 0x195   : > { %904 = vst [vmem:[%s1721_s15 + $0x208] sm:$0xff] (%p1423_p9), %v903_v2 }
 0x196   : > { %906 = vst [vmem:[%s1721_s15 + $0x210] sm:$0xff] (%p1423_p9), %v905_v19 }
 0x197   : > { %v500_v20 = vpop.trf.xlu2  ;;  %1006 = vst [vmem:[%s1721_s15 + $0x520] sm:$0xff] (%p1423_p9), %v1005_v6 }
 0x198   : > { %v435_v21 = vpop.trf.xlu1  ;;  %597 = vst.msk [vmem:[%s1519_s6 + $0x2b8] sm:$0xff] %vm509_vm6, %v500_v20  ;;  %v907_v20 = vld [vmem:[%s1519_s6 + $0x118] sm:$0xff] (%p1423_p9) }
 0x199   : > { %564 = vst.msk [vmem:[%s1519_s6 + $0x1b0] sm:$0xff] %vm509_vm6, %v435_v21  ;;  %v371_v22 = vpop.trf.xlu0  ;;  %v879_v7 = vld [vmem:[%s1519_s6 + $0xa8] sm:$0xff] (%p1423_p9)  ;;  %v909_v21 = vld [vmem:[%s1519_s6 + $0x120] sm:$0xff] (%p1423_p9) }
 0x19a   : > { %532 = vst.msk [vmem:[%s1519_s6 + $0xb0] sm:$0xff] %vm509_vm6, %v371_v22  ;;  %v911_v22 = vld [vmem:[%s1519_s6 + $0x128] sm:$0xff] (%p1423_p9) }
 0x19b   : > { %880 = vst [vmem:[%s1721_s15 + $0x128] sm:$0xff] (%p1423_p9), %v879_v7  ;;  %v1007_v7 = vld [vmem:[%s1519_s6 + $0x2a8] sm:$0xff] (%p1423_p9) }
 0x19c   : > { %908 = vst [vmem:[%s1721_s15 + $0x218] sm:$0xff] (%p1423_p9), %v907_v20 }
 0x19d   : > { %910 = vst [vmem:[%s1721_s15 + $0x220] sm:$0xff] (%p1423_p9), %v909_v21 }
 0x19e   : > { %912 = vst [vmem:[%s1721_s15 + $0x228] sm:$0xff] (%p1423_p9), %v911_v22 }
 0x19f   : > { %v501_v23 = vpop.trf.xlu2  ;;  %1008 = vst [vmem:[%s1721_s15 + $0x528] sm:$0xff] (%p1423_p9), %v1007_v7 }
 0x1a0   : > { %v436_v24 = vpop.trf.xlu1  ;;  %598 = vst.msk [vmem:[%s1519_s6 + $0x2c0] sm:$0xff] %vm509_vm6, %v501_v23  ;;  %v913_v23 = vld [vmem:[%s1519_s6 + $0x130] sm:$0xff] (%p1423_p9) }
 0x1a1   : > { %565 = vst.msk [vmem:[%s1519_s6 + $0x1b8] sm:$0xff] %vm509_vm6, %v436_v24  ;;  %v372_v25 = vpop.trf.xlu0  ;;  %v881_v8 = vld [vmem:[%s1519_s6 + $0xb0] sm:$0xff] (%p1423_p9)  ;;  %v915_v24 = vld [vmem:[%s1519_s6 + $0x138] sm:$0xff] (%p1423_p9) }
 0x1a2   : > { %533 = vst.msk [vmem:[%s1519_s6 + $0xb8] sm:$0xff] %vm509_vm6, %v372_v25  ;;  %v917_v25 = vld [vmem:[%s1519_s6 + $0x140] sm:$0xff] (%p1423_p9) }
 0x1a3   : > { %882 = vst [vmem:[%s1721_s15 + $0x130] sm:$0xff] (%p1423_p9), %v881_v8  ;;  %v1009_v8 = vld [vmem:[%s1519_s6 + $0x2b0] sm:$0xff] (%p1423_p9) }
 0x1a4   : > { %914 = vst [vmem:[%s1721_s15 + $0x230] sm:$0xff] (%p1423_p9), %v913_v23 }
 0x1a5   : > { %916 = vst [vmem:[%s1721_s15 + $0x238] sm:$0xff] (%p1423_p9), %v915_v24 }
 0x1a6   : > { %918 = vst [vmem:[%s1721_s15 + $0x240] sm:$0xff] (%p1423_p9), %v917_v25 }
 0x1a7   : > { %v502_v26 = vpop.trf.xlu2  ;;  %1010 = vst [vmem:[%s1721_s15 + $0x530] sm:$0xff] (%p1423_p9), %v1009_v8 }
 0x1a8   : > { %v437_v27 = vpop.trf.xlu1  ;;  %599 = vst.msk [vmem:[%s1519_s6 + $0x2c8] sm:$0xff] %vm509_vm6, %v502_v26  ;;  %v919_v26 = vld [vmem:[%s1519_s6 + $0x148] sm:$0xff] (%p1423_p9) }
 0x1a9   : > { %566 = vst.msk [vmem:[%s1519_s6 + $0x1c0] sm:$0xff] %vm509_vm6, %v437_v27  ;;  %v373_v28 = vpop.trf.xlu0  ;;  %v883_v9 = vld [vmem:[%s1519_s6 + $0xb8] sm:$0xff] (%p1423_p9)  ;;  %v921_v27 = vld [vmem:[%s1519_s6 + $0x150] sm:$0xff] (%p1423_p9) }
 0x1aa   : > { %534 = vst.msk [vmem:[%s1519_s6 + $0xc0] sm:$0xff] %vm509_vm6, %v373_v28  ;;  %v923_v28 = vld [vmem:[%s1519_s6 + $0x158] sm:$0xff] (%p1423_p9) }
 0x1ab   : > { %884 = vst [vmem:[%s1721_s15 + $0x138] sm:$0xff] (%p1423_p9), %v883_v9  ;;  %v1011_v9 = vld [vmem:[%s1519_s6 + $0x2b8] sm:$0xff] (%p1423_p9) }
 0x1ac   : > { %920 = vst [vmem:[%s1721_s15 + $0x248] sm:$0xff] (%p1423_p9), %v919_v26 }
 0x1ad   : > { %922 = vst [vmem:[%s1721_s15 + $0x250] sm:$0xff] (%p1423_p9), %v921_v27 }
 0x1ae   : > { %924 = vst [vmem:[%s1721_s15 + $0x258] sm:$0xff] (%p1423_p9), %v923_v28 }
 0x1af   : > { %v503_v29 = vpop.trf.xlu2  ;;  %1012 = vst [vmem:[%s1721_s15 + $0x538] sm:$0xff] (%p1423_p9), %v1011_v9 }
 0x1b0   : > { %v438_v30 = vpop.trf.xlu1  ;;  %600 = vst.msk [vmem:[%s1519_s6 + $0x2d0] sm:$0xff] %vm509_vm6, %v503_v29  ;;  %v925_v29 = vld [vmem:[%s1519_s6 + $0x160] sm:$0xff] (%p1423_p9) }
 0x1b1   : > { %567 = vst.msk [vmem:[%s1519_s6 + $0x1c8] sm:$0xff] %vm509_vm6, %v438_v30  ;;  %v374_v31 = vpop.trf.xlu0  ;;  %v885_v10 = vld [vmem:[%s1519_s6 + $0xc0] sm:$0xff] (%p1423_p9)  ;;  %v927_v30 = vld [vmem:[%s1519_s6 + $0x168] sm:$0xff] (%p1423_p9) }
 0x1b2   : > { %535 = vst.msk [vmem:[%s1519_s6 + $0xc8] sm:$0xff] %vm509_vm6, %v374_v31  ;;  %v929_v31 = vld [vmem:[%s1519_s6 + $0x170] sm:$0xff] (%p1423_p9) }
 0x1b3   : > { %886 = vst [vmem:[%s1721_s15 + $0x140] sm:$0xff] (%p1423_p9), %v885_v10  ;;  %v1013_v10 = vld [vmem:[%s1519_s6 + $0x2c0] sm:$0xff] (%p1423_p9) }
 0x1b4   : > { %926 = vst [vmem:[%s1721_s15 + $0x260] sm:$0xff] (%p1423_p9), %v925_v29 }
 0x1b5   : > { %928 = vst [vmem:[%s1721_s15 + $0x268] sm:$0xff] (%p1423_p9), %v927_v30 }
 0x1b6   : > { %930 = vst [vmem:[%s1721_s15 + $0x270] sm:$0xff] (%p1423_p9), %v929_v31 }
 0x1b7   : > { %v504_v32 = vpop.trf.xlu2  ;;  %1014 = vst [vmem:[%s1721_s15 + $0x540] sm:$0xff] (%p1423_p9), %v1013_v10 }
 0x1b8   : > { %v439_v33 = vpop.trf.xlu1  ;;  %601 = vst.msk [vmem:[%s1519_s6 + $0x2d8] sm:$0xff] %vm509_vm6, %v504_v32  ;;  %v931_v32 = vld [vmem:[%s1519_s6 + $0x178] sm:$0xff] (%p1423_p9) }
 0x1b9   : > { %568 = vst.msk [vmem:[%s1519_s6 + $0x1d0] sm:$0xff] %vm509_vm6, %v439_v33  ;;  %v375_v34 = vpop.trf.xlu0  ;;  %v887_v11 = vld [vmem:[%s1519_s6 + $0xc8] sm:$0xff] (%p1423_p9)  ;;  %v933_v33 = vld [vmem:[%s1519_s6 + $0x180] sm:$0xff] (%p1423_p9) }
 0x1ba   : > { %536 = vst.msk [vmem:[%s1519_s6 + $0xd0] sm:$0xff] %vm509_vm6, %v375_v34  ;;  %v935_v34 = vld [vmem:[%s1519_s6 + $0x188] sm:$0xff] (%p1423_p9) }
 0x1bb   : > { %888 = vst [vmem:[%s1721_s15 + $0x148] sm:$0xff] (%p1423_p9), %v887_v11  ;;  %v1015_v11 = vld [vmem:[%s1519_s6 + $0x2c8] sm:$0xff] (%p1423_p9) }
 0x1bc   : > { %932 = vst [vmem:[%s1721_s15 + $0x278] sm:$0xff] (%p1423_p9), %v931_v32 }
 0x1bd   : > { %934 = vst [vmem:[%s1721_s15 + $0x300] sm:$0xff] (%p1423_p9), %v933_v33 }
 0x1be   : > { %936 = vst [vmem:[%s1721_s15 + $0x308] sm:$0xff] (%p1423_p9), %v935_v34 }
 0x1bf   : > { %v505_v35 = vpop.trf.xlu2  ;;  %1016 = vst [vmem:[%s1721_s15 + $0x548] sm:$0xff] (%p1423_p9), %v1015_v11 }
 0x1c0   : > { %v440_v36 = vpop.trf.xlu1  ;;  %602 = vst.msk [vmem:[%s1519_s6 + $0x2e0] sm:$0xff] %vm509_vm6, %v505_v35  ;;  %v937_v35 = vld [vmem:[%s1519_s6 + $0x190] sm:$0xff] (%p1423_p9) }
 0x1c1   : > { %569 = vst.msk [vmem:[%s1519_s6 + $0x1d8] sm:$0xff] %vm509_vm6, %v440_v36  ;;  %v376_v37 = vpop.trf.xlu0  ;;  %v889_v12 = vld [vmem:[%s1519_s6 + $0xd0] sm:$0xff] (%p1423_p9)  ;;  %v939_v36 = vld [vmem:[%s1519_s6 + $0x198] sm:$0xff] (%p1423_p9) }
 0x1c2   : > { %537 = vst.msk [vmem:[%s1519_s6 + $0xd8] sm:$0xff] %vm509_vm6, %v376_v37  ;;  %v941_v37 = vld [vmem:[%s1519_s6 + $0x1a0] sm:$0xff] (%p1423_p9) }
 0x1c3   : > { %890 = vst [vmem:[%s1721_s15 + $0x150] sm:$0xff] (%p1423_p9), %v889_v12  ;;  %v1017_v12 = vld [vmem:[%s1519_s6 + $0x2d0] sm:$0xff] (%p1423_p9) }
 0x1c4   : > { %938 = vst [vmem:[%s1721_s15 + $0x310] sm:$0xff] (%p1423_p9), %v937_v35 }
 0x1c5   : > { %940 = vst [vmem:[%s1721_s15 + $0x318] sm:$0xff] (%p1423_p9), %v939_v36 }
 0x1c6   : > { %942 = vst [vmem:[%s1721_s15 + $0x320] sm:$0xff] (%p1423_p9), %v941_v37 }
 0x1c7   : > { %v506_v38 = vpop.trf.xlu2  ;;  %1018 = vst [vmem:[%s1721_s15 + $0x550] sm:$0xff] (%p1423_p9), %v1017_v12 }
 0x1c8   : > { %v441_v39 = vpop.trf.xlu1  ;;  %603 = vst.msk [vmem:[%s1519_s6 + $0x2e8] sm:$0xff] %vm509_vm6, %v506_v38  ;;  %v943_v38 = vld [vmem:[%s1519_s6 + $0x1a8] sm:$0xff] (%p1423_p9) }
 0x1c9   : > { %570 = vst.msk [vmem:[%s1519_s6 + $0x1e0] sm:$0xff] %vm509_vm6, %v441_v39  ;;  %v377_v40 = vpop.trf.xlu0  ;;  %v891_v13 = vld [vmem:[%s1519_s6 + $0xd8] sm:$0xff] (%p1423_p9)  ;;  %v945_v39 = vld [vmem:[%s1519_s6 + $0x1b0] sm:$0xff] (%p1423_p9) }
 0x1ca   : > { %538 = vst.msk [vmem:[%s1519_s6 + $0xe0] sm:$0xff] %vm509_vm6, %v377_v40  ;;  %v947_v40 = vld [vmem:[%s1519_s6 + $0x1b8] sm:$0xff] (%p1423_p9) }
 0x1cb   : > { %892 = vst [vmem:[%s1721_s15 + $0x158] sm:$0xff] (%p1423_p9), %v891_v13  ;;  %v1019_v13 = vld [vmem:[%s1519_s6 + $0x2d8] sm:$0xff] (%p1423_p9) }
 0x1cc   : > { %944 = vst [vmem:[%s1721_s15 + $0x328] sm:$0xff] (%p1423_p9), %v943_v38 }
 0x1cd   : > { %946 = vst [vmem:[%s1721_s15 + $0x330] sm:$0xff] (%p1423_p9), %v945_v39 }
 0x1ce   : > { %948 = vst [vmem:[%s1721_s15 + $0x338] sm:$0xff] (%p1423_p9), %v947_v40 }
 0x1cf   : > { %v507_v41 = vpop.trf.xlu2  ;;  %1020 = vst [vmem:[%s1721_s15 + $0x558] sm:$0xff] (%p1423_p9), %v1019_v13 }
 0x1d0   : > { %v442_v42 = vpop.trf.xlu1  ;;  %604 = vst.msk [vmem:[%s1519_s6 + $0x2f0] sm:$0xff] %vm509_vm6, %v507_v41  ;;  %v949_v41 = vld [vmem:[%s1519_s6 + $0x1c0] sm:$0xff] (%p1423_p9) }
 0x1d1   : > { %571 = vst.msk [vmem:[%s1519_s6 + $0x1e8] sm:$0xff] %vm509_vm6, %v442_v42  ;;  %v378_v43 = vpop.trf.xlu0  ;;  %v893_v14 = vld [vmem:[%s1519_s6 + $0xe0] sm:$0xff] (%p1423_p9)  ;;  %v951_v42 = vld [vmem:[%s1519_s6 + $0x1c8] sm:$0xff] (%p1423_p9) }
 0x1d2   : > { %539 = vst.msk [vmem:[%s1519_s6 + $0xe8] sm:$0xff] %vm509_vm6, %v378_v43  ;;  %v953_v43 = vld [vmem:[%s1519_s6 + $0x1d0] sm:$0xff] (%p1423_p9) }
 0x1d3   : > { %894 = vst [vmem:[%s1721_s15 + $0x160] sm:$0xff] (%p1423_p9), %v893_v14  ;;  %v1021_v14 = vld [vmem:[%s1519_s6 + $0x2e0] sm:$0xff] (%p1423_p9) }
 0x1d4   : > { %950 = vst [vmem:[%s1721_s15 + $0x340] sm:$0xff] (%p1423_p9), %v949_v41 }
 0x1d5   : > { %952 = vst [vmem:[%s1721_s15 + $0x348] sm:$0xff] (%p1423_p9), %v951_v42 }
 0x1d6   : > { %954 = vst [vmem:[%s1721_s15 + $0x350] sm:$0xff] (%p1423_p9), %v953_v43 }
 0x1d7   : > { %v508_v44 = vpop.trf.xlu2  ;;  %1022 = vst [vmem:[%s1721_s15 + $0x560] sm:$0xff] (%p1423_p9), %v1021_v14 }
 0x1d8   : > { %v443_v45 = vpop.trf.xlu1  ;;  %605 = vst.msk [vmem:[%s1519_s6 + $0x2f8] sm:$0xff] %vm509_vm6, %v508_v44  ;;  %v955_v44 = vld [vmem:[%s1519_s6 + $0x1d8] sm:$0xff] (%p1423_p9) }
 0x1d9   : > { %572 = vst.msk [vmem:[%s1519_s6 + $0x1f0] sm:$0xff] %vm509_vm6, %v443_v45  ;;  %v379_v46 = vpop.trf.xlu0  ;;  %v895_v15 = vld [vmem:[%s1519_s6 + $0xe8] sm:$0xff] (%p1423_p9)  ;;  %v957_v45 = vld [vmem:[%s1519_s6 + $0x1e0] sm:$0xff] (%p1423_p9) }
 0x1da   : > { %540 = vst.msk [vmem:[%s1519_s6 + $0xf0] sm:$0xff] %vm509_vm6, %v379_v46  ;;  %v959_v46 = vld [vmem:[%s1519_s6 + $0x1e8] sm:$0xff] (%p1423_p9) }
 0x1db   : > { %896 = vst [vmem:[%s1721_s15 + $0x168] sm:$0xff] (%p1423_p9), %v895_v15  ;;  %v1023_v15 = vld [vmem:[%s1519_s6 + $0x2e8] sm:$0xff] (%p1423_p9) }
 0x1dc   : > { %956 = vst [vmem:[%s1721_s15 + $0x358] sm:$0xff] (%p1423_p9), %v955_v44 }
 0x1dd   : > { %958 = vst [vmem:[%s1721_s15 + $0x360] sm:$0xff] (%p1423_p9), %v957_v45 }
 0x1de   : > { %612 = sbr.rel (!%p1423_p9) target bundleno = 492 (0x1ec), region = 40  ;;  %960 = vst [vmem:[%s1721_s15 + $0x368] sm:$0xff] (%p1423_p9), %v959_v46 }
 0x1df   : > { %1024 = vst [vmem:[%s1721_s15 + $0x568] sm:$0xff] (%p1423_p9), %v1023_v15 }
 0x1e0   : > { %v444_v47 = vpop.trf.xlu1 }
 0x1e1   : > { %573 = vst.msk [vmem:[%s1519_s6 + $0x1f8] sm:$0xff] %vm509_vm6, %v444_v47  ;;  %v380_v48 = vpop.trf.xlu0  ;;  %v897_v16 = vld [vmem:[%s1519_s6 + $0xf0] sm:$0xff] (%p1423_p9) }
 0x1e2   : > { %541 = vst.msk [vmem:[%s1519_s6 + $0xf8] sm:$0xff] %vm509_vm6, %v380_v48  ;;  %v961_v47 = vld [vmem:[%s1519_s6 + $0x1f0] sm:$0xff] (%p1423_p9) }
 0x1e3   : > { %898 = vst [vmem:[%s1721_s15 + $0x170] sm:$0xff] %v897_v16  ;;  %v1025_v16 = vld [vmem:[%s1519_s6 + $0x2f0] sm:$0xff] }
 0x1e4   : > { %962 = vst [vmem:[%s1721_s15 + $0x370] sm:$0xff] %v961_v47 }
 0x1e5   : > { %1026 = vst [vmem:[%s1721_s15 + $0x570] sm:$0xff] %v1025_v16 }
 0x1e8   : > { %v963_v48 = vld [vmem:[%s1519_s6 + $0x1f8] sm:$0xff] }
 0x1e9   : > { %v899_v17 = vld [vmem:[%s1519_s6 + $0xf8] sm:$0xff]  ;;  %964 = vst [vmem:[%s1721_s15 + $0x378] sm:$0xff] %v963_v48 }
 0x1ea   : > { %900 = vst [vmem:[%s1721_s15 + $0x178] sm:$0xff] %v899_v17  ;;  %v1027_v17 = vld [vmem:[%s1519_s6 + $0x2f8] sm:$0xff] }
 0x1eb   : > { %1028 = vst [vmem:[%s1721_s15 + $0x578] sm:$0xff] %v1027_v17 }
 0x1ec PF: > { %s18_s14 = sadd.s32 1, %s1352_s14   ;;  %s1940_s9 = smov %s1336_s10 }
 0x1ed   : > { %p15_p1 = scmp.ge.s32.totalorder %s18_s14, 4   ;;  %s1941_s10 = smov %s1340_s11 }
 0x1ee   : > { %s1942_s11 = smov %s1421_s21  ;;  %s1943_s12 = smov %s1348_s13 }
 0x1ef   : > { %s1944_s13 = smov %s1946_s16  ;;  %17 = sbr.rel (!%p15_p1) target bundleno = 6 (0x6), region = 119 }
 0x1f4   :  { %1044 = vsyncpa [#allocation3], 1 }
 0x1f5   :  { %1046 = vsyncpa [#allocation3 + $0x1], 1 }
 0x1f6   :  { %1047 = vsyncpa [#allocation5], 1 }
 0x1f7   :  { %1049 = vsyncpa [#allocation5 + $0x1], 1 }

// kernel: tpu_custom_call.1
= control target key start
LH: loop header
LB: loop body
LE: loop exit
PB: predicated region body
PF: predicated region fallthrough
CT: control target
= control target key end

     0   :  { %7 = vsyncpa [#allocation3], 0  ;;  %s947_s0 = inlined_call_operand.hbm [shape: f32[2,256], index: 0, kind: input, shape index: {}]   ;;  %s948_s1 = inlined_call_operand.hbm [shape: f32[2,3,8,256], index: 1, kind: input, shape index: {}]   ;;  %s949_s2 = inlined_call_operand.hbm [shape: f32[2,3,8,256], index: 2, kind: output, shape index: {}]  }
   0x1   :  { %9 = vsyncpa [#allocation3 + $0x1], 0 }
   0x2   :  { %10 = vsyncpa [#allocation6], 0 }
   0x3   :  { %12 = vsyncpa [#allocation6 + $0x1], 0 }
   0x4   :  { %13 = vsyncpa [#allocation4], 0 }
   0x5   :  { %15 = vsyncpa [#allocation4 + $0x1], 0  ;;  %s736_s9 = smov 0   ;;  %s738_s10 = smov 0  }
   0x6   :  { %s740_s11 = smov 0   ;;  %s742_s12 = smov 0  }
   0x7   :  { %s744_s13 = smov 0   ;;  %s746_s14 = smov 0  }
   0x8 LB: > { %s452_s15 = sadd.s32 4294967295, %s712_s14   ;;  %s453_s16 = sadd.s32 4294967294, %s712_s14   ;;  %s712_s14 = sphi %s746_s14, %s21_s14   ;;  %s708_s13 = sphi %s744_s13, %s961_s13   ;;  %s704_s12 = sphi %s742_s12, %s960_s12   ;;  %s700_s11 = sphi %s740_s11, %s959_s11   ;;  %s696_s10 = sphi %s738_s10, %s958_s10   ;;  %s692_s9 = sphi %s736_s9, %s957_s9  }
   0x9   : > { %s30_s17 = sadd.s32 1, %s708_s13  ;;  %s40_s18 = sadd.s32 1, %s700_s11 }
   0xa   : > { %p31_p0 = scmp.ge.s32.totalorder %s30_s17, 2  ;;  %p47_p1 = scmp.ne.s32.totalorder %s700_s11, %s696_s10 }
   0xb   : > { %p48_p2 = scmp.eq.s32.totalorder %s712_s14, 0  ;;  %p53_p3 = scmp.ne.s32.totalorder %s696_s10, %s692_s9 }
   0xc   : > { %s963_s17 = smov (%p31_p0, %s30_s17), 0  ;;  %p54_p5 = scmp.eq.s32.totalorder %s452_s15, 0 }
   0xd   : > { %p777_p4 = por %p48_p2, %p47_p1  ;;  %s37_s20 = ssub.s32 %s708_s13, %s963_s17 }
   0xe   : > { %p107_p6 = scmp.eq.s32.totalorder %s452_s15, 1  ;;  %p38_p7 = scmp.eq.s32.totalorder %s37_s20, 0 }
   0xf   : > { %p783_p8 = por %p54_p5, %p53_p3  ;;  %p113_p10 = scmp.eq.s32.totalorder %s453_s16, 1 }
  0x10   : > { %p787_p9 = por %p107_p6, %p47_p1  ;;  %p455_p12 = scmp.ge.s32.totalorder %s712_s14, 2 }
  0x11   : > { %s792_s23 = scalar_select %p38_p7, %s700_s11, %s40_s18  }
  0x12   : > { %p794_p11 = por %p113_p10, %p53_p3  ;;  %p483_p13 = scmp.lt.s32.totalorder %s712_s14, 2 }
  0x13   : > { %s801_s25 = sand.u32 1, %s700_s11   ;;  %s457_s27 = sshll.u32 %s708_s13, 1 }
  0x14   : > { %s456_s26 = sshll.u32 %s801_s25, 1  ;;  %s141_s30 = scalar_lea.hbm %s947_s0, %s457_s27 }
  0x15   : > { %s137_s3 = scalar_lea.vmem [#allocation2], %s456_s26  ;;  %s143_s5 = sshll.u32 %s141_s30, 4  ;;  %s144_s5 = int_to_ptr.hbm [resolvable:$true] %s143_s5 }
  0x16   : > { %s145_s4 = sshll.u32 %s137_s3, 4  ;;  %p810_p0 = pnand %p483_p13, %p777_p4  ;;  %s146_s4 = int_to_ptr.vmem [resolvable:$true] %s145_s4 }
  0x17   : > { %s464_s7 = smul.u32 48, %s801_s25  ;;  %s458_s8 = sshll.u32 %s708_s13, 3 }
  0x18   : > { %s134_s15 = scalar_lea.sflag [#allocation3], %s801_s25  ;;  %p459_p1 = scmp.ge.s32.totalorder %s712_s14, 1 }
  0x19   : > { %475 = dma.hbm_to_vmem [thread:$0]  (!%p810_p0), %s144_s5, 32, %s146_s4, %s134_s15  }
  0x1a   : > { %p174_p2 = scmp.lt.s32.totalorder %s712_s14, 3  ;;  %s163_s20 = scalar_lea.hbm %s948_s1, %s458_s8 }
  0x1b   : > { %s164_s26 = sshll.u32 %s163_s20, 4  ;;  %s156_s27 = scalar_lea.vmem [#allocation5], %s464_s7  ;;  %s165_s26 = int_to_ptr.hbm [resolvable:$true] %s164_s26 }
  0x1c   : > { %s166_s19 = sshll.u32 %s156_s27, 4  ;;  %p175_p3 = pnand %p459_p1, %p174_p2  ;;  %s167_s19 = int_to_ptr.vmem [resolvable:$true] %s166_s19 }
  0x1d   : > { %s153_s28 = scalar_lea.sflag [#allocation6], %s801_s25  ;;  %s714_s29 = smov 256  }
  0x1e   : > { %s715_s30 = smov 128   ;;  %s716_s3 = smov 8  }
  0x1f   : > { %478 = dma.hbm_to_vmem [thread:$0]  (!%p810_p0), %s165_s26, 768, %s167_s19, %s153_s28, %s714_s29, %s715_s30, %s716_s3  }
  0x20   : > { %178 = sbr.rel (%p175_p3) target bundleno = 82 (0x52), region = 28  ;;  %s828_s4 = sand.u32 (!%p175_p3), 1, %s696_s10  }
  0x21   : > { %s460_s5 = sshll.u32 (!%p175_p3), %s828_s4, 1  ;;  %s181_s8 = scalar_lea.sflag (!%p175_p3), [#allocation3], %s828_s4 }
  0x22   : > { %s832_s7 = scalar_lea.vmem (!%p175_p3), [#allocation2], %s460_s5 }
  0x25   : > { %679 = dma.done.wait (%p783_p8), %s181_s8, 32  }
  0x26   : > { %681 = vsyncadd (%p783_p8), %s181_s8, 4294967264  ;;  %s465_s25 = smul.u32 48, %s828_s4  ;;  %s191_s6 = scalar_lea.sflag [#allocation6], %s828_s4 }
  0x28   : > { %s194_s15 = scalar_lea.vmem [#allocation5], %s465_s25 }
  0x29   : > { %683 = dma.done.wait (%p783_p8), %s191_s6, 768  }
  0x2a   : > { %685 = vsyncadd (%p783_p8), %s191_s6, 4294966528  ;;  %v229_v0 = vlaneseq  ;;  %v223_v3 = vld [vmem:[%s194_s15] sm:$0xff]  ;;  %v224_v5 = vld [vmem:[%s194_s15 + $0x8] sm:$0xff]  ;;  %v717_v38 = vmov 1.0   ;;  %s461_s21 = sshll.u32 %s704_s12, 3  ;;  %s220_s12 = scalar_lea.vmem [#allocation7], %s465_s25 }
  0x2b   : > { %v234_v4 = vsub.f32 0.0, %v223_v3  ;;  %v235_v6 = vsub.f32 0.0, %v224_v5  ;;  %v225_v7 = vld [vmem:[%s194_s15 + $0x10] sm:$0xff]  ;;  %v226_v8 = vld [vmem:[%s194_s15 + $0x18] sm:$0xff]  ;;  %v227_v9 = vld [vmem:[%s194_s15 + $0x20] sm:$0xff]  ;;  %s893_s20 = scalar_lea.hbm %s949_s2, %s461_s21  ;;  %s341_s26 = sshll.u32 %s220_s12, 4  ;;  %s902_s26 = int_to_ptr.vmem [resolvable:$true] %s341_s26 }
  0x2c   : > { %v846_v1 = vshrl.u32 %v229_v0, 7  ;;  %v236_v11 = vsub.f32 0.0, %v225_v7  ;;  %v237_v12 = vsub.f32 0.0, %v226_v8  ;;  %v228_v13 = vld [vmem:[%s194_s15 + $0x28] sm:$0xff]  ;;  %v238_v16 = vsub.f32 0.0, %v227_v9  ;;  %s343_s27 = sshll.u32 %s893_s20, 4  ;;  %s344_s27 = int_to_ptr.hbm [resolvable:$true] %s343_s27 }
  0x2d   : > { %v239_v20 = vsub.f32 0.0, %v228_v13  ;;  %v540_v28 = vld [vmem:[%s832_s7 + $0x1] ss:$0 sm:$0xff]  ;;  %v541_v34 = vld [vmem:[%s832_s7] ss:$0 sm:$0xff]  ;;  %s327_s19 = scalar_lea.sflag [#allocation4], %s828_s4 }
  0x2e   : > { %vm231_vm0 = vcmp.eq.s32.totalorder %v846_v1, 2  ;;  %vm232_vm1 = vcmp.eq.s32.totalorder %v846_v1, 3  ;;  %vm275_vm3 = vcmp.eq.s32.totalorder %v846_v1, 1  ;;  %vm274_vm4 = vcmp.eq.s32.totalorder %v846_v1, 0  ;;  %s640_s28 = sshra.s32 %s344_s27, 4  ;;  %s646_s5 = scalar_lea.hbm %s949_s2, 96  ;;  %s641_s28 = int_to_ptr.hbm [resolvable:$true] %s640_s28 }
  0x2f   : > { %vm854_vm2 = vmor %vm231_vm0, %vm232_vm1  ;;  %v279_v37 = vsel %vm275_vm3, %v540_v28, 0.0  ;;  %v300_v39 = vsel %vm232_vm1, 13.0, %v717_v38  ;;  %v301_v42 = vsel %vm232_vm1, 30.0, %v717_v38  ;;  %vm284_vm5 = vcmp.lt.s32.totalorder %v846_v1, 2  ;;  %s642_s29 = scalar_lea.hbm %s641_s28, 48  ;;  %p647_p7 = scmp.lt.s32.totalorder %s641_s28, %s949_s2 }
  0x30   : > { %v242_v10 = vsel %vm854_vm2, %v223_v3, %v234_v4  ;;  %v243_v15 = vsel %vm854_vm2, %v224_v5, %v235_v6  ;;  %v244_v18 = vsel %vm854_vm2, %v225_v7, %v236_v11  ;;  %v245_v19 = vsel %vm854_vm2, %v226_v8, %v237_v12  ;;  %p643_p4 = scmp.ne.s32.totalorder %s641_s28, %s642_s29  ;;  %p648_p8 = scmp.lt.s32.totalorder %s646_s5, %s642_s29 }
  0x31   : > { %v248_v14 = vmul.f32 1.442695, %v242_v10  ;;  %v250_v17 = vmul.f32 1.442695, %v243_v15  ;;  %v252_v21 = vmul.f32 1.442695, %v244_v18  ;;  %v246_v23 = vsel %vm854_vm2, %v227_v9, %v238_v16 }
  0x32   : > { %v254_v22 = vmul.f32 1.442695, %v245_v19  ;;  %v256_v24 = vmul.f32 1.442695, %v246_v23  ;;  %v247_v25 = vsel %vm854_vm2, %v228_v13, %v239_v20  ;;  %v302_v44 = vsel %vm232_vm1, 23.0, %v717_v38  ;;  %p644_p5 = pnand %p643_p4, %p787_p9  ;;  %p649_p10 = por %p648_p8, %p647_p7 }
  0x33   : > { %542 = vpow2.f32 %v248_v14  ;;  %v258_v26 = vmul.f32 1.442695, %v247_v25  ;;  %v283_v46 = vsel %vm274_vm4, %v541_v34, %v279_v37  ;;  %v305_v47 = vsel %vm231_vm0, 10.0, %v300_v39 }
  0x34   : > { %544 = vpow2.f32 %v250_v17  ;;  %v306_v48 = vsel %vm231_vm0, 16.0, %v301_v42  ;;  %v285_v50 = vsel %vm284_vm5, 8.0, %v717_v38  ;;  %v307_v51 = vsel %vm231_vm0, 33.0, %v302_v44  ;;  %p645_p6 = pneg %p644_p5 }
  0x35   : > { %546 = vpow2.f32 %v252_v21 }
  0x36   : > { %548 = vpow2.f32 %v254_v22  ;;  %p650_p13 = pnand %p649_p10, %p645_p6 }
  0x37   : > { %550 = vpow2.f32 %v256_v24 }
  0x38   : > { %552 = vpow2.f32 %v258_v26 }
  0x39   : > { %v543_v27 = vpop.eup %542 }
  0x3a   : > { %v545_v29 = vpop.eup %544  ;;  %v260_v30 = vadd.f32 1.0, %v543_v27  ;;  %v308_v54 = vmul.f32 %v543_v27, %v305_v47 }
  0x3b   : > { %v547_v31 = vpop.eup %546  ;;  %v261_v32 = vadd.f32 1.0, %v545_v29  ;;  %v309_v57 = vmul.f32 %v545_v29, %v306_v48 }
  0x3c   : > { %v549_v33 = vpop.eup %548  ;;  %554 = vrcp.f32 %v260_v30  ;;  %v262_v35 = vadd.f32 1.0, %v547_v31  ;;  %v310_v61 = vmul.f32 %v547_v31, %v307_v51 }
  0x3d   : > { %v551_v36 = vpop.eup %550  ;;  %556 = vrcp.f32 %v261_v32  ;;  %v263_v40 = vadd.f32 1.0, %v549_v33  ;;  %v311_v1 = vmul.f32 %v549_v33, %v305_v47 }
  0x3e   : > { %v553_v41 = vpop.eup %552  ;;  %558 = vrcp.f32 %v262_v35  ;;  %v264_v43 = vadd.f32 1.0, %v551_v36  ;;  %v312_v7 = vmul.f32 %v551_v36, %v306_v48 }
  0x3f   : > { %560 = vrcp.f32 %v263_v40  ;;  %v265_v45 = vadd.f32 1.0, %v553_v41  ;;  %v313_v11 = vmul.f32 %v553_v41, %v307_v51 }
  0x40   : > { %562 = vrcp.f32 %v264_v43 }
  0x41   : > { %564 = vrcp.f32 %v265_v45 }
  0x42   : > { %v555_v49 = vpop.eup %554 }
  0x43   : > { %v557_v52 = vpop.eup %556  ;;  %v286_v53 = vadd.f32 %v555_v49, %v283_v46 }
  0x44   : > { %v559_v55 = vpop.eup %558  ;;  %v287_v56 = vadd.f32 %v557_v52, %v283_v46 }
  0x45   : > { %v561_v58 = vpop.eup %560  ;;  %v292_v59 = vmul.f32 %v286_v53, %v285_v50  ;;  %v288_v60 = vadd.f32 %v559_v55, %v283_v46 }
  0x46   : > { %v563_v62 = vpop.eup %562  ;;  %v293_v63 = vmul.f32 %v287_v56, %v285_v50  ;;  %v289_v0 = vadd.f32 %v561_v58, %v283_v46 }
  0x47   : > { %v565_v3 = vpop.eup %564  ;;  %v314_v4 = vsel %vm854_vm2, %v308_v54, %v292_v59  ;;  %v294_v5 = vmul.f32 %v288_v60, %v285_v50  ;;  %v290_v6 = vadd.f32 %v563_v62, %v283_v46 }
  0x48   : > { %320 = vst [vmem:[%s220_s12] sm:$0xff] %v314_v4  ;;  %v315_v8 = vsel %vm854_vm2, %v309_v57, %v293_v63  ;;  %v295_v9 = vmul.f32 %v289_v0, %v285_v50  ;;  %v291_v10 = vadd.f32 %v565_v3, %v283_v46 }
  0x49   : > { %321 = vst [vmem:[%s220_s12 + $0x8] sm:$0xff] %v315_v8  ;;  %v316_v12 = vsel %vm854_vm2, %v310_v61, %v294_v5  ;;  %v296_v13 = vmul.f32 %v290_v6, %v285_v50 }
  0x4a   : > { %322 = vst [vmem:[%s220_s12 + $0x10] sm:$0xff] %v316_v12  ;;  %v317_v14 = vsel %vm854_vm2, %v311_v1, %v295_v9  ;;  %v297_v15 = vmul.f32 %v291_v10, %v285_v50 }
  0x4b   : > { %323 = vst [vmem:[%s220_s12 + $0x18] sm:$0xff] %v317_v14  ;;  %v318_v16 = vsel %vm854_vm2, %v312_v7, %v296_v13 }
  0x4c   : > { %324 = vst [vmem:[%s220_s12 + $0x20] sm:$0xff] %v318_v16  ;;  %v319_v17 = vsel %vm854_vm2, %v313_v11, %v297_v15 }
  0x4d   : > { %325 = vst [vmem:[%s220_s12 + $0x28] sm:$0xff] %v319_v17 }
  0x4e   : > { %653 = shalt.err (!%p650_p13)
}
  0x4f   : > { %s718_s4 = smov 128   ;;  %s719_s25 = smov 256  }
  0x50   : > { %s720_s6 = smov 8  }
  0x51   : > { %470 = dma.vmem_to_hbm [thread:$0]  (%p787_p9), %s902_s26, 768, %s344_s27, %s327_s19, %s718_s4, %s719_s25, %s720_s6  }
  0x52 PF: > { %s358_s15 = sand.u32 1, %s692_s9   ;;  %p480_p0 = pnand %p455_p12, %p794_p11 }
  0x53   : > { %s359_s21 = scalar_lea.sflag [#allocation4], %s358_s15 }
  0x54   : > { %p481_p1 = pneg %p480_p0 }
  0x56   : > { %687 = dma.done.wait (%p481_p1), %s359_s21, 768  }
  0x57   : > { %689 = vsyncadd (%p481_p1), %s359_s21, 4294966528  ;;  %s21_s14 = sadd.s32 1, %s712_s14   ;;  %s957_s9 = smov %s696_s10 }
  0x58   : > { %p18_p2 = scmp.ge.s32.totalorder %s21_s14, 4   ;;  %s958_s10 = smov %s700_s11 }
  0x59   : > { %s959_s11 = smov %s792_s23  ;;  %s960_s12 = smov %s708_s13 }
  0x5a   : > { %s961_s13 = smov %s963_s17  ;;  %20 = sbr.rel (!%p18_p2) target bundleno = 8 (0x8), region = 86 }
  0x5f   :  { %365 = vsyncpa [#allocation3], 1 }
  0x60   :  { %367 = vsyncpa [#allocation3 + $0x1], 1 }
  0x61   :  { %368 = vsyncpa [#allocation6], 1 }
  0x62   :  { %370 = vsyncpa [#allocation6 + $0x1], 1 }
  0x63   :  { %371 = vsyncpa [#allocation4], 1 }
  0x64   :  { %373 = vsyncpa [#allocation4 + $0x1], 1 }

</bundles_post_ra>
